<compile_context>
chip_gen: v6e
topology: v6e:2x2x1
jax: 0.10.0
libtpu: 0.0.40
codegen_flags: <defaults>
</compile_context>

<pallas_src>
import jax
import jax.numpy as jnp
from jax import lax
from jax.experimental import pallas as pl
from jax.experimental.pallas import tpu as pltpu

NEG_SLOPE = 0.01  # F.leaky_relu default


def _leaky_relu(x):
    return jnp.where(x > 0, x, NEG_SLOPE * x)


def dqn_kernel(x_ref, w1_ref, wstk_ref, vec_ref, b5_ref, out_ref):
    """x_ref: (bt, in) f32; w1_ref: (in, H) bf16; wstk_ref: (3, H, H) bf16;
    vec_ref: (5, H) f32 with rows [b1, b2, b3, b4, w5]; b5_ref: (1,1) f32 SMEM;
    out_ref: (1, bt) f32 (lane-dense)."""
    # fc1: cast x -> bf16 on the VPU (free slot), MXU matmul, f32 accumulate.
    h = jnp.dot(x_ref[...].astype(jnp.bfloat16), w1_ref[...],
                preferred_element_type=jnp.float32)
    h = _leaky_relu(h + vec_ref[0:1, :])

    # fc2..fc4 (unrolled at trace time).
    for l in range(3):
        h = jnp.dot(h.astype(jnp.bfloat16), wstk_ref[l],
                    preferred_element_type=jnp.float32)
        h = _leaky_relu(h + vec_ref[l + 1:l + 2, :])

    # fc5 (hidden -> 1): (1,H) x (bt,H)^T "NT" dot_general so the result is
    # already (1, bt) with the batch on the lane axis -> unmasked stores.
    w5 = vec_ref[4:5, :].astype(jnp.bfloat16)
    y = lax.dot_general(w5, h.astype(jnp.bfloat16),
                        (((1,), (1,)), ((), ())),
                        preferred_element_type=jnp.float32)
    out_ref[...] = (y + b5_ref[0, 0]).astype(out_ref.dtype)


def _num_tensorcores_per_chip():
    try:
        kind = jax.devices()[0].device_kind.lower()
    except Exception:
        return 1
    return 2 if ("v7" in kind or "7x" in kind) else 1


def _pick_batch_tile(B, n_cores):
    """Single-TC (v5e/v6e): one full-batch tile (no serial grid overhead) up to
    a VMEM-friendly cap.  2-TC (v7x): exactly 2 parallel tiles when the halves
    are 128-lane aligned (keeps the (1, B) output block legal & unmasked)."""
    if n_cores >= 2:
        half = B // 2
        if B % 2 == 0 and half % 128 == 0:
            return half
    if B <= 8192:
        return B
    for t in (8192, 4096, 2048, 1024, 512, 256, 128):
        if B % t == 0:
            return t
    return B


def dqn_forward(x, params, *, batch_tile=None):
    """x: (B, in_size) float32. params: dict from init_params(). Returns (B, 1)."""
    B, in_size = x.shape
    H = params["w1"].shape[1]

    if batch_tile is None:
        batch_tile = _pick_batch_tile(B, _num_tensorcores_per_chip())
    assert B % batch_tile == 0, "batch_tile must divide B"
    assert batch_tile == B or (batch_tile % 128 == 0), \
        "partial tiles must be 128-lane aligned for the lane-dense output"
    grid = (B // batch_tile,)

    in_specs = [
        pl.BlockSpec((batch_tile, in_size), lambda i: (i, 0)),   # x (f32)
        pl.BlockSpec((in_size, H), lambda i: (0, 0)),            # w1 (bf16)
        pl.BlockSpec((3, H, H), lambda i: (0, 0, 0)),            # w2..w4 (bf16)
        pl.BlockSpec((5, H), lambda i: (0, 0)),                  # b1..b4, w5 (f32)
        pl.BlockSpec((1, 1), lambda i: (0, 0),
                     memory_space=pltpu.MemorySpace.SMEM),       # b5 scalar
    ]
    out_specs = pl.BlockSpec((1, batch_tile), lambda i: (0, i))  # lane-dense row

    ordered_params = (params["w1"], params["w234"], params["bias_w5"],
                      params["b5"])

    flops = 2 * B * (in_size * H + 3 * H * H + H)
    param_bytes = sum(int(p.size) * p.dtype.itemsize for p in ordered_params)
    bytes_accessed = int(x.size) * x.dtype.itemsize + B * 4 + param_bytes
    cost = pl.CostEstimate(flops=flops, transcendentals=0,
                           bytes_accessed=bytes_accessed)

    out_row = pl.pallas_call(
        dqn_kernel,
        out_shape=jax.ShapeDtypeStruct((1, B), jnp.float32),
        grid=grid,
        in_specs=in_specs,
        out_specs=out_specs,
        compiler_params=pltpu.CompilerParams(
            dimension_semantics=("parallel",)),  # shards tiles across v7x TCs
        cost_estimate=cost,
    )(x, *ordered_params)

    return out_row.reshape(B, 1)


def init_params(key, in_size, hidden):
    """Deterministic synthetic init (PyTorch-Linear-like uniform fan-in scaling),
    packed for the kernel:
      w1      : (in_size, hidden) bf16       (x @ W layout)
      w234    : (3, hidden, hidden) bf16     (fc2..fc4 stacked, x @ W layout)
      bias_w5 : (5, hidden) f32              (rows 0..3 = b1..b4, row 4 = w5)
      b5      : (1, 1) f32                   (fc5 bias scalar, lives in SMEM)
    """
    sizes = [(in_size, hidden), (hidden, hidden), (hidden, hidden),
             (hidden, hidden), (hidden, 1)]
    ws, bs = [], []
    for fan_in, fan_out in sizes:
        key, kw, kb = jax.random.split(key, 3)
        bound = 1.0 / (fan_in ** 0.5)
        ws.append(jax.random.uniform(kw, (fan_in, fan_out), jnp.float32,
                                     -bound, bound))
        bs.append(jax.random.uniform(kb, (1, fan_out), jnp.float32,
                                     -bound, bound))
    return {
        "w1": ws[0].astype(jnp.bfloat16),
        "w234": jnp.stack([w.astype(jnp.bfloat16) for w in ws[1:4]], axis=0),
        "bias_w5": jnp.concatenate(bs[0:4] + [ws[4].T], axis=0),  # (5, hidden)
        "b5": bs[4],                                              # (1, 1)
    }


def dqn_forward_ref(x, params, *, full_f32=False):
    """Pure-JAX reference. full_f32=False mirrors the kernel's dtype path
    (bf16 matmul operands, f32 accumulation); full_f32=True is the f32
    PyTorch-parity reference (looser tolerance)."""
    ws = [params["w1"]] + [params["w234"][i] for i in range(3)]
    bs = [params["bias_w5"][i:i + 1, :] for i in range(4)]
    w5 = params["bias_w5"][4:5, :]
    h = x
    for w, b in zip(ws, bs):
        if full_f32:
            h = jnp.dot(h, w.astype(jnp.float32)) + b
        else:
            h = jnp.dot(h.astype(jnp.bfloat16), w,
                        preferred_element_type=jnp.float32) + b
        h = _leaky_relu(h)
    if full_f32:
        return jnp.dot(h, w5.T) + params["b5"]
    return jnp.dot(h.astype(jnp.bfloat16), w5.astype(jnp.bfloat16).T,
                   preferred_element_type=jnp.float32) + params["b5"]


if __name__ == "__main__":
    key = jax.random.PRNGKey(0)
    in_size = 6        # e.g. ABM state vector size
    hidden = 32        # hidden_layers_size
    batch = 512        # 1 tile on v5e/v6e, 2 parallel 256-row tiles on v7x

    key, kx, kp = jax.random.split(key, 3)
    x = jax.random.normal(kx, (batch, in_size), jnp.float32)
    params = init_params(kp, in_size, hidden)

    out = jax.block_until_ready(dqn_forward(x, params))
    assert out.shape == (batch, 1)

    # Tight check vs a reference that applies identical bf16 quantization.
    ref_bf16 = dqn_forward_ref(x, params, full_f32=False)
    assert jnp.allclose(out, ref_bf16, atol=2e-3, rtol=2e-3), \
        "mismatch vs bf16-matched reference"

    # Looser check vs the full-f32 (PyTorch-parity) reference.
    ref_f32 = dqn_forward_ref(x, params, full_f32=True)
    assert jnp.allclose(out, ref_f32, atol=5e-2, rtol=5e-2), \
        "mismatch vs f32 reference"

    print("KERNEL_OK")
</pallas_src>

<mosaic_0001>
module attributes {stable_mosaic.version = 11 : i64} {
  func.func @dqn_kernel(%arg0: i32, %arg1: memref<512x6xf32, #tpu.memory_space<vmem>>, %arg2: memref<6x32xbf16, #tpu.memory_space<vmem>>, %arg3: memref<3x32x32xbf16, #tpu.memory_space<vmem>>, %arg4: memref<5x32xf32, #tpu.memory_space<vmem>>, %arg5: memref<1x1xf32, #tpu.memory_space<smem>>, %arg6: memref<1x512xf32, #tpu.memory_space<vmem>>) attributes {dimension_semantics = [#tpu.dimension_semantics<parallel>], iteration_bounds = array<i64: 1>, scalar_prefetch = 0 : i64, scratch_operands = 0 : i64, tpu.core_type = #tpu.core_type<tc>, window_params = [{transform_indices = @transform_0, window_bounds = array<i64: 512, 6>}, {pipeline_mode = #tpu.pipeline_mode<synchronous>, transform_indices = @transform_1, window_bounds = array<i64: 6, 32>}, {pipeline_mode = #tpu.pipeline_mode<synchronous>, transform_indices = @transform_2, window_bounds = array<i64: 3, 32, 32>}, {pipeline_mode = #tpu.pipeline_mode<synchronous>, transform_indices = @transform_3, window_bounds = array<i64: 5, 32>}, {transform_indices = @transform_4, window_bounds = array<i64: 1, 1>}, {transform_indices = @transform_5, window_bounds = array<i64: 1, 512>}]} {
    %c0 = arith.constant 0 : index
    %c0_0 = arith.constant 0 : index
    %0 = vector.load %arg1[%c0, %c0_0] : memref<512x6xf32, #tpu.memory_space<vmem>>, vector<512x6xf32>
    %1 = arith.truncf %0 : vector<512x6xf32> to vector<512x6xbf16>
    %c0_1 = arith.constant 0 : index
    %c0_2 = arith.constant 0 : index
    %2 = vector.load %arg2[%c0_1, %c0_2] : memref<6x32xbf16, #tpu.memory_space<vmem>>, vector<6x32xbf16>
    %cst = arith.constant dense<0.000000e+00> : vector<512x32xf32>
    %3 = tpu.matmul %1, %2, %cst {dimension_numbers = #tpu.dot_dimension_numbers<[1], [0], [0], [1], [0, 0, 1, 1], [], []>} : vector<512x6xbf16>, vector<6x32xbf16>, vector<512x32xf32> -> vector<512x32xf32>
    %c0_3 = arith.constant 0 : index
    %c0_4 = arith.constant 0 : index
    %4 = vector.load %arg4[%c0_3, %c0_4] : memref<5x32xf32, #tpu.memory_space<vmem>>, vector<1x32xf32>
    %5 = vector.broadcast %4 : vector<1x32xf32> to vector<512x32xf32>
    %6 = arith.addf %3, %5 : vector<512x32xf32>
    %cst_5 = arith.constant 0.000000e+00 : f32
    %7 = vector.broadcast %cst_5 : f32 to vector<512x32xf32>
    %8 = arith.cmpf ogt, %6, %7 : vector<512x32xf32>
    %cst_6 = arith.constant 0.00999999977 : f32
    %9 = vector.broadcast %cst_6 : f32 to vector<512x32xf32>
    %10 = arith.mulf %9, %6 : vector<512x32xf32>
    %11 = arith.select %8, %6, %10 : vector<512x32xi1>, vector<512x32xf32>
    %12 = arith.truncf %11 : vector<512x32xf32> to vector<512x32xbf16>
    %c0_7 = arith.constant 0 : index
    %c0_8 = arith.constant 0 : index
    %c0_9 = arith.constant 0 : index
    %13 = vector.load %arg3[%c0_7, %c0_8, %c0_9] : memref<3x32x32xbf16, #tpu.memory_space<vmem>>, vector<1x32x32xbf16>
    %14 = vector.shape_cast %13 : vector<1x32x32xbf16> to vector<32x32xbf16>
    %cst_10 = arith.constant dense<0.000000e+00> : vector<512x32xf32>
    %15 = tpu.matmul %12, %14, %cst_10 {dimension_numbers = #tpu.dot_dimension_numbers<[1], [0], [0], [1], [0, 0, 1, 1], [], []>} : vector<512x32xbf16>, vector<32x32xbf16>, vector<512x32xf32> -> vector<512x32xf32>
    %c1 = arith.constant 1 : index
    %c0_11 = arith.constant 0 : index
    %16 = vector.load %arg4[%c1, %c0_11] : memref<5x32xf32, #tpu.memory_space<vmem>>, vector<1x32xf32>
    %17 = vector.broadcast %16 : vector<1x32xf32> to vector<512x32xf32>
    %18 = arith.addf %15, %17 : vector<512x32xf32>
    %cst_12 = arith.constant 0.000000e+00 : f32
    %19 = vector.broadcast %cst_12 : f32 to vector<512x32xf32>
    %20 = arith.cmpf ogt, %18, %19 : vector<512x32xf32>
    %cst_13 = arith.constant 0.00999999977 : f32
    %21 = vector.broadcast %cst_13 : f32 to vector<512x32xf32>
    %22 = arith.mulf %21, %18 : vector<512x32xf32>
    %23 = arith.select %20, %18, %22 : vector<512x32xi1>, vector<512x32xf32>
    %24 = arith.truncf %23 : vector<512x32xf32> to vector<512x32xbf16>
    %c1_14 = arith.constant 1 : index
    %c0_15 = arith.constant 0 : index
    %c0_16 = arith.constant 0 : index
    %25 = vector.load %arg3[%c1_14, %c0_15, %c0_16] : memref<3x32x32xbf16, #tpu.memory_space<vmem>>, vector<1x32x32xbf16>
    %26 = vector.shape_cast %25 : vector<1x32x32xbf16> to vector<32x32xbf16>
    %cst_17 = arith.constant dense<0.000000e+00> : vector<512x32xf32>
    %27 = tpu.matmul %24, %26, %cst_17 {dimension_numbers = #tpu.dot_dimension_numbers<[1], [0], [0], [1], [0, 0, 1, 1], [], []>} : vector<512x32xbf16>, vector<32x32xbf16>, vector<512x32xf32> -> vector<512x32xf32>
    %c2 = arith.constant 2 : index
    %c0_18 = arith.constant 0 : index
    %28 = vector.load %arg4[%c2, %c0_18] : memref<5x32xf32, #tpu.memory_space<vmem>>, vector<1x32xf32>
    %29 = vector.broadcast %28 : vector<1x32xf32> to vector<512x32xf32>
    %30 = arith.addf %27, %29 : vector<512x32xf32>
    %cst_19 = arith.constant 0.000000e+00 : f32
    %31 = vector.broadcast %cst_19 : f32 to vector<512x32xf32>
    %32 = arith.cmpf ogt, %30, %31 : vector<512x32xf32>
    %cst_20 = arith.constant 0.00999999977 : f32
    %33 = vector.broadcast %cst_20 : f32 to vector<512x32xf32>
    %34 = arith.mulf %33, %30 : vector<512x32xf32>
    %35 = arith.select %32, %30, %34 : vector<512x32xi1>, vector<512x32xf32>
    %36 = arith.truncf %35 : vector<512x32xf32> to vector<512x32xbf16>
    %c2_21 = arith.constant 2 : index
    %c0_22 = arith.constant 0 : index
    %c0_23 = arith.constant 0 : index
    %37 = vector.load %arg3[%c2_21, %c0_22, %c0_23] : memref<3x32x32xbf16, #tpu.memory_space<vmem>>, vector<1x32x32xbf16>
    %38 = vector.shape_cast %37 : vector<1x32x32xbf16> to vector<32x32xbf16>
    %cst_24 = arith.constant dense<0.000000e+00> : vector<512x32xf32>
    %39 = tpu.matmul %36, %38, %cst_24 {dimension_numbers = #tpu.dot_dimension_numbers<[1], [0], [0], [1], [0, 0, 1, 1], [], []>} : vector<512x32xbf16>, vector<32x32xbf16>, vector<512x32xf32> -> vector<512x32xf32>
    %c3 = arith.constant 3 : index
    %c0_25 = arith.constant 0 : index
    %40 = vector.load %arg4[%c3, %c0_25] : memref<5x32xf32, #tpu.memory_space<vmem>>, vector<1x32xf32>
    %41 = vector.broadcast %40 : vector<1x32xf32> to vector<512x32xf32>
    %42 = arith.addf %39, %41 : vector<512x32xf32>
    %cst_26 = arith.constant 0.000000e+00 : f32
    %43 = vector.broadcast %cst_26 : f32 to vector<512x32xf32>
    %44 = arith.cmpf ogt, %42, %43 : vector<512x32xf32>
    %cst_27 = arith.constant 0.00999999977 : f32
    %45 = vector.broadcast %cst_27 : f32 to vector<512x32xf32>
    %46 = arith.mulf %45, %42 : vector<512x32xf32>
    %47 = arith.select %44, %42, %46 : vector<512x32xi1>, vector<512x32xf32>
    %c4 = arith.constant 4 : index
    %c0_28 = arith.constant 0 : index
    %48 = vector.load %arg4[%c4, %c0_28] : memref<5x32xf32, #tpu.memory_space<vmem>>, vector<1x32xf32>
    %49 = arith.truncf %48 : vector<1x32xf32> to vector<1x32xbf16>
    %50 = arith.truncf %47 : vector<512x32xf32> to vector<512x32xbf16>
    %cst_29 = arith.constant dense<0.000000e+00> : vector<1x512xf32>
    %51 = tpu.matmul %49, %50, %cst_29 {dimension_numbers = #tpu.dot_dimension_numbers<[1], [1], [0], [0], [0, 0, 1, 0], [], []>} : vector<1x32xbf16>, vector<512x32xbf16>, vector<1x512xf32> -> vector<1x512xf32>
    %c0_30 = arith.constant 0 : index
    %c0_31 = arith.constant 0 : index
    %52 = memref.load %arg5[%c0_30, %c0_31] : memref<1x1xf32, #tpu.memory_space<smem>>
    %53 = vector.broadcast %52 : f32 to vector<1x512xf32>
    %54 = arith.addf %51, %53 : vector<1x512xf32>
    %c0_32 = arith.constant 0 : index
    %c0_33 = arith.constant 0 : index
    %55 = vector.load %arg6[%c0_32, %c0_33] : memref<1x512xf32, #tpu.memory_space<vmem>>, vector<1x512xf32>
    tpu.vector_store %arg6[%c0_32, %c0_33], %54 {strides = array<i32>} : memref<1x512xf32, #tpu.memory_space<vmem>>, vector<1x512xf32>,
    return
  }
  func.func @transform_0(%arg0: i32) -> (i32, i32) {
    %c0_i32 = arith.constant 0 : i32
    %c0_i32_0 = arith.constant 0 : i32
    return %arg0, %c0_i32 : i32, i32
  }
  func.func @transform_1(%arg0: i32) -> (i32, i32) {
    %c0_i32 = arith.constant 0 : i32
    %c0_i32_0 = arith.constant 0 : i32
    %c0_i32_1 = arith.constant 0 : i32
    return %c0_i32, %c0_i32_0 : i32, i32
  }
  func.func @transform_2(%arg0: i32) -> (i32, i32, i32) {
    %c0_i32 = arith.constant 0 : i32
    %c0_i32_0 = arith.constant 0 : i32
    %c0_i32_1 = arith.constant 0 : i32
    %c0_i32_2 = arith.constant 0 : i32
    return %c0_i32, %c0_i32_0, %c0_i32_1 : i32, i32, i32
  }
  func.func @transform_3(%arg0: i32) -> (i32, i32) {
    %c0_i32 = arith.constant 0 : i32
    %c0_i32_0 = arith.constant 0 : i32
    %c0_i32_1 = arith.constant 0 : i32
    return %c0_i32, %c0_i32_0 : i32, i32
  }
  func.func @transform_4(%arg0: i32) -> (i32, i32) {
    %c0_i32 = arith.constant 0 : i32
    %c0_i32_0 = arith.constant 0 : i32
    %c0_i32_1 = arith.constant 0 : i32
    return %c0_i32, %c0_i32_0 : i32, i32
  }
  func.func @transform_5(%arg0: i32) -> (i32, i32) {
    %c0_i32 = arith.constant 0 : i32
    %c0_i32_0 = arith.constant 0 : i32
    return %c0_i32, %arg0 : i32, i32
  }
}

</mosaic_0001>

<bundles_post_ra>
// kernel: tpu_custom_call.1
= control target key start
LH: loop header
LB: loop body
LE: loop exit
PB: predicated region body
PF: predicated region fallthrough
CT: control target
= control target key end

     0   :  { %vm222_vm0 = vcmask 1042432   ;;  %vm125_vm1 = vcmask 48128   ;;  %s4385_s0 = inlined_call_operand.vmem [shape: f32[512,6], index: 0, kind: input, shape index: {}]   ;;  %s4386_s1 = inlined_call_operand.vmem [shape: bf16[6,32], index: 1, kind: input, shape index: {}]   ;;  %s4387_s2 = inlined_call_operand.vmem [shape: bf16[3,32,32], index: 2, kind: input, shape index: {}]   ;;  %s4388_s3 = inlined_call_operand.vmem [shape: f32[5,32], index: 3, kind: input, shape index: {}]   ;;  %s4389_s4 = inlined_call_operand.<no memory space> [shape: f32[1,1], index: 4, kind: input, shape index: {}]   ;;  %s4390_s5 = inlined_call_operand.hbm [shape: f32[1,512], index: 5, kind: output, shape index: {}]  }
   0x1   :  { %v119_v0 = vld [vmem:[%s4386_s1] sm:$0x7]  ;;  %v24_v2 = vld [vmem:[%s4385_s0 + $0x8] sm:$0xff]  ;;  %v25_v5 = vld [vmem:[%s4385_s0 + $0x10] sm:$0xff] }
   0x2   :  { %v23_v1 = vld [vmem:[%s4385_s0] sm:$0xff]  ;;  %3454 = vmatprep.subr.msk.bf16.mxu0 %vm222_vm0, %v119_v0  ;;  %v224_v3 = vsel %vm222_vm0, %v119_v0, 0  ;;  %v26_v6 = vld [vmem:[%s4385_s0 + $0x18] sm:$0xff]  ;;  %v28_v9 = vld [vmem:[%s4385_s0 + $0x28] sm:$0xff] }
   0x3   :  { %v87_v4 = vpack.c.bf16 %v24_v2, %v23_v1  ;;  %v27_v7 = vld [vmem:[%s4385_s0 + $0x20] sm:$0xff]  ;;  %3185 = vmatpush3.bf16.msra.mxu0 %v224_v3  ;;  %v88_v8 = vpack.c.bf16 %v26_v6, %v25_v5  ;;  %v29_v11 = vld [vmem:[%s4385_s0 + $0x30] sm:$0xff]  ;;  %v30_v12 = vld [vmem:[%s4385_s0 + $0x38] sm:$0xff] }
   0x4   :  { %v89_v10 = vpack.c.bf16 %v28_v9, %v27_v7  ;;  %v31_v13 = vld [vmem:[%s4385_s0 + $0x40] sm:$0xff]  ;;  %v32_v14 = vld [vmem:[%s4385_s0 + $0x48] sm:$0xff]  ;;  %v90_v15 = vpack.c.bf16 %v30_v12, %v29_v11  ;;  %v33_v17 = vld [vmem:[%s4385_s0 + $0x50] sm:$0xff] }
   0x5   :  { %3186 = vmatprep.mubr.msk.bf16.mxu0 %vm125_vm1, %v87_v4  ;;  %v91_v16 = vpack.c.bf16 %v32_v14, %v31_v13  ;;  %v34_v18 = vld [vmem:[%s4385_s0 + $0x58] sm:$0xff]  ;;  %v35_v19 = vld [vmem:[%s4385_s0 + $0x60] sm:$0xff]  ;;  %v36_v20 = vld [vmem:[%s4385_s0 + $0x68] sm:$0xff] }
   0x6   :  { %3187 = vmatmul.mubr.msk.bf16.vlgmr.msra.gmra.mxu0 %vm125_vm1, %v88_v8  ;;  %v92_v21 = vpack.c.bf16 %v34_v18, %v33_v17  ;;  %v93_v22 = vpack.c.bf16 %v36_v20, %v35_v19  ;;  %v37_v23 = vld [vmem:[%s4385_s0 + $0x70] sm:$0xff]  ;;  %v38_v24 = vld [vmem:[%s4385_s0 + $0x78] sm:$0xff]  ;;  %v39_v25 = vld [vmem:[%s4385_s0 + $0x80] sm:$0xff] }
   0x7   :  { %3190 = vmatprep.mubr.msk.bf16.mxu0 %vm125_vm1, %v89_v10  ;;  %v40_v26 = vld [vmem:[%s4385_s0 + $0x88] sm:$0xff]  ;;  %v94_v27 = vpack.c.bf16 %v38_v24, %v37_v23 }
   0xe   :  { %3191 = vmatmul.mubr.msk.bf16.gmra.mxu0 %vm125_vm1, %v90_v15 }
   0xf   :  { %3194 = vmatprep.mubr.msk.bf16.mxu0 %vm125_vm1, %v91_v16 }
  0x16   :  { %3195 = vmatmul.mubr.msk.bf16.gmra.mxu0 %vm125_vm1, %v92_v21 }
  0x17   :  { %3198 = vmatprep.mubr.msk.bf16.mxu0 %vm125_vm1, %v93_v22 }
  0x18   :  { %11 = vsyncpa [#allocation4], 0  ;;  %v95_v28 = vpack.c.bf16 %v40_v26, %v39_v25  ;;  %v41_v29 = vld [vmem:[%s4385_s0 + $0x90] sm:$0xff]  ;;  %v42_v30 = vld [vmem:[%s4385_s0 + $0x98] sm:$0xff]  ;;  %vm760_vm6 = vcmask 261120  }
  0x19   :  { %v43_v31 = vld [vmem:[%s4385_s0 + $0xa0] sm:$0xff]  ;;  %v44_v32 = vld [vmem:[%s4385_s0 + $0xa8] sm:$0xff]  ;;  %v96_v33 = vpack.c.bf16 %v42_v30, %v41_v29  ;;  %v45_v35 = vld [vmem:[%s4385_s0 + $0xb0] sm:$0xff] }
  0x1a   :  { %v97_v34 = vpack.c.bf16 %v44_v32, %v43_v31  ;;  %v46_v36 = vld [vmem:[%s4385_s0 + $0xb8] sm:$0xff]  ;;  %v47_v37 = vld [vmem:[%s4385_s0 + $0xc0] sm:$0xff]  ;;  %v48_v38 = vld [vmem:[%s4385_s0 + $0xc8] sm:$0xff] }
  0x1b   :  { %v98_v39 = vpack.c.bf16 %v46_v36, %v45_v35  ;;  %v99_v40 = vpack.c.bf16 %v48_v38, %v47_v37  ;;  %v49_v41 = vld [vmem:[%s4385_s0 + $0xd0] sm:$0xff]  ;;  %v50_v42 = vld [vmem:[%s4385_s0 + $0xd8] sm:$0xff]  ;;  %v51_v43 = vld [vmem:[%s4385_s0 + $0xe0] sm:$0xff] }
  0x1c   :  { %v52_v44 = vld [vmem:[%s4385_s0 + $0xe8] sm:$0xff]  ;;  %v100_v45 = vpack.c.bf16 %v50_v42, %v49_v41  ;;  %v53_v47 = vld [vmem:[%s4385_s0 + $0xf0] sm:$0xff]  ;;  %v54_v48 = vld [vmem:[%s4385_s0 + $0xf8] sm:$0xff] }
  0x1d   :  { %v101_v46 = vpack.c.bf16 %v52_v44, %v51_v43  ;;  %v55_v49 = vld [vmem:[%s4385_s0 + $0x100] sm:$0xff]  ;;  %v56_v50 = vld [vmem:[%s4385_s0 + $0x108] sm:$0xff]  ;;  %v102_v51 = vpack.c.bf16 %v54_v48, %v53_v47  ;;  %v57_v53 = vld [vmem:[%s4385_s0 + $0x110] sm:$0xff] }
  0x1e   :  { %3199 = vmatmul.mubr.msk.bf16.gmra.mxu0 %vm125_vm1, %v94_v27  ;;  %v103_v52 = vpack.c.bf16 %v56_v50, %v55_v49  ;;  %v58_v54 = vld [vmem:[%s4385_s0 + $0x118] sm:$0xff]  ;;  %v59_v55 = vld [vmem:[%s4385_s0 + $0x120] sm:$0xff]  ;;  %v60_v56 = vld [vmem:[%s4385_s0 + $0x128] sm:$0xff] }
  0x1f   :  { %3202 = vmatprep.mubr.msk.bf16.mxu0 %vm125_vm1, %v95_v28  ;;  %v104_v57 = vpack.c.bf16 %v58_v54, %v57_v53  ;;  %v105_v58 = vpack.c.bf16 %v60_v56, %v59_v55  ;;  %v61_v59 = vld [vmem:[%s4385_s0 + $0x130] sm:$0xff]  ;;  %v62_v60 = vld [vmem:[%s4385_s0 + $0x138] sm:$0xff]  ;;  %v63_v61 = vld [vmem:[%s4385_s0 + $0x140] sm:$0xff] }
  0x20   :  { %v64_v62 = vld [vmem:[%s4385_s0 + $0x148] sm:$0xff]  ;;  %v106_v63 = vpack.c.bf16 %v62_v60, %v61_v59  ;;  %v65_v2 = vld [vmem:[%s4385_s0 + $0x150] sm:$0xff]  ;;  %v66_v3 = vld [vmem:[%s4385_s0 + $0x158] sm:$0xff] }
  0x21   :  { %v107_v0 = vpack.c.bf16 %v64_v62, %v63_v61  ;;  %v3473_v1 = vld [vmem:[%s4387_s2 + $0x8] sm:$0xff]   ;;  %v3474_v4 = vld [vmem:[%s4387_s2] sm:$0xff]   ;;  %v108_v7 = vpack.c.bf16 %v66_v3, %v65_v2  ;;  %v69_v9 = vld [vmem:[%s4385_s0 + $0x170] sm:$0xff] }
  0x22   :  { %3250 = vmatprep.subr.bf16.mxu1 %v3473_v1  ;;  %v67_v5 = vld [vmem:[%s4385_s0 + $0x160] sm:$0xff]  ;;  %v68_v6 = vld [vmem:[%s4385_s0 + $0x168] sm:$0xff]  ;;  %v70_v10 = vld [vmem:[%s4385_s0 + $0x178] sm:$0xff] }
  0x23   :  { %3251 = vmatpush3.bf16.msra.mxu1 %v3473_v1  ;;  %v109_v8 = vpack.c.bf16 %v68_v6, %v67_v5  ;;  %v71_v11 = vld [vmem:[%s4385_s0 + $0x180] sm:$0xff]  ;;  %v72_v12 = vld [vmem:[%s4385_s0 + $0x188] sm:$0xff]  ;;  %v110_v13 = vpack.c.bf16 %v70_v10, %v69_v9  ;;  %v73_v15 = vld [vmem:[%s4385_s0 + $0x190] sm:$0xff] }
  0x24   :  { %3252 = vmatprep.subr.bf16.mxu1 %v3474_v4  ;;  %v111_v14 = vpack.c.bf16 %v72_v12, %v71_v11  ;;  %v74_v16 = vld [vmem:[%s4385_s0 + $0x198] sm:$0xff]  ;;  %v75_v17 = vld [vmem:[%s4385_s0 + $0x1a0] sm:$0xff]  ;;  %v76_v18 = vld [vmem:[%s4385_s0 + $0x1a8] sm:$0xff] }
  0x25   :  { %v112_v19 = vpack.c.bf16 %v74_v16, %v73_v15  ;;  %v113_v20 = vpack.c.bf16 %v76_v18, %v75_v17  ;;  %v77_v21 = vld [vmem:[%s4385_s0 + $0x1b0] sm:$0xff]  ;;  %v78_v22 = vld [vmem:[%s4385_s0 + $0x1b8] sm:$0xff]  ;;  %v79_v23 = vld [vmem:[%s4385_s0 + $0x1c0] sm:$0xff] }
  0x26   :  { %3203 = vmatmul.mubr.msk.bf16.gmra.mxu0 %vm125_vm1, %v96_v33  ;;  %v80_v24 = vld [vmem:[%s4385_s0 + $0x1c8] sm:$0xff]  ;;  %v114_v25 = vpack.c.bf16 %v78_v22, %v77_v21  ;;  %v81_v27 = vld [vmem:[%s4385_s0 + $0x1d0] sm:$0xff]  ;;  %v82_v28 = vld [vmem:[%s4385_s0 + $0x1d8] sm:$0xff] }
  0x27   :  { %3206 = vmatprep.mubr.msk.bf16.mxu0 %vm125_vm1, %v97_v34  ;;  %3253 = vmatpush3.bf16.msra.mxu1 %v3474_v4  ;;  %v115_v26 = vpack.c.bf16 %v80_v24, %v79_v23  ;;  %v83_v29 = vld [vmem:[%s4385_s0 + $0x1e0] sm:$0xff]  ;;  %v84_v30 = vld [vmem:[%s4385_s0 + $0x1e8] sm:$0xff]  ;;  %v116_v31 = vpack.c.bf16 %v82_v28, %v81_v27  ;;  %v85_v33 = vld [vmem:[%s4385_s0 + $0x1f0] sm:$0xff] }
  0x28   :  { %v117_v32 = vpack.c.bf16 %v84_v30, %v83_v29  ;;  %v86_v34 = vld [vmem:[%s4385_s0 + $0x1f8] sm:$0xff]  ;;  %v3769_v37 = vld [vmem:[%s4388_s3] ss:$0 sm:$0xff] }
  0x29   :  { %v118_v35 = vpack.c.bf16 %v86_v34, %v85_v33  ;;  %v3475_v47 = vld [vmem:[%s4387_s2 + $0x18] sm:$0xff]  }
  0x2a   :  { %3318 = vmatprep.subr.bf16.mxu0 %v3475_v47 }
  0x2b   :  { %3319 = vmatpush3.bf16.msra.mxu0 %v3475_v47 }
  0x2e   :  { %3207 = vmatmul.mubr.msk.bf16.gmra.mxu0 %vm125_vm1, %v98_v39 }
  0x2f   :  { %3210 = vmatprep.mubr.msk.bf16.mxu0 %vm125_vm1, %v99_v40 }
  0x36   :  { %3211 = vmatmul.mubr.msk.bf16.gmra.mxu0 %vm125_vm1, %v100_v45 }
  0x37   :  { %3214 = vmatprep.mubr.msk.bf16.mxu0 %vm125_vm1, %v101_v46 }
  0x3e   :  { %3215 = vmatmul.mubr.msk.bf16.gmra.mxu0 %vm125_vm1, %v102_v51 }
  0x3f   :  { %3218 = vmatprep.mubr.msk.bf16.mxu0 %vm125_vm1, %v103_v52 }
  0x46   :  { %3219 = vmatmul.mubr.msk.bf16.gmra.mxu0 %vm125_vm1, %v104_v57 }
  0x47   :  { %3222 = vmatprep.mubr.msk.bf16.mxu0 %vm125_vm1, %v105_v58 }
  0x4e   :  { %3223 = vmatmul.mubr.msk.bf16.gmra.mxu0 %vm125_vm1, %v106_v63 }
  0x4f   :  { %3226 = vmatprep.mubr.msk.bf16.mxu0 %vm125_vm1, %v107_v0 }
  0x56   :  { %3227 = vmatmul.mubr.msk.bf16.gmra.mxu0 %vm125_vm1, %v108_v7 }
  0x57   :  { %3230 = vmatprep.mubr.msk.bf16.mxu0 %vm125_vm1, %v109_v8 }
  0x5e   :  { %3231 = vmatmul.mubr.msk.bf16.gmra.mxu0 %vm125_vm1, %v110_v13 }
  0x5f   :  { %3234 = vmatprep.mubr.msk.bf16.mxu0 %vm125_vm1, %v111_v14 }
  0x66   :  { %3235 = vmatmul.mubr.msk.bf16.gmra.mxu0 %vm125_vm1, %v112_v19 }
  0x67   :  { %3238 = vmatprep.mubr.msk.bf16.mxu0 %vm125_vm1, %v113_v20 }
  0x6e   :  { %3239 = vmatmul.mubr.msk.bf16.gmra.mxu0 %vm125_vm1, %v114_v25 }
  0x6f   :  { %3242 = vmatprep.mubr.msk.bf16.mxu0 %vm125_vm1, %v115_v26 }
  0x76   :  { %3243 = vmatmul.mubr.msk.bf16.gmra.mxu0 %vm125_vm1, %v116_v31 }
  0x77   :  { %3246 = vmatprep.mubr.msk.bf16.mxu0 %vm125_vm1, %v117_v32 }
  0x7e   :  { %3247 = vmatmul.mubr.msk.bf16.gmra.mxu0 %vm125_vm1, %v118_v35 }
  0xc6   :  { %v3188_v36 = vpop.f32.mrf.mxu0 }
  0xc7   :  { %v269_v40 = vadd.f32 %v3188_v36, %v3769_v37 }
  0xc8   :  { %v260_v38 = vpop.f32.mrf.mxu0 }
  0xc9   :  { %v261_v39 = vadd.f32 %v3769_v37, %v260_v38  ;;  %v581_v48 = vmul.f32 0.01, %v269_v40  ;;  %vm517_vm4 = vcmp.gt.f32.partialorder %v269_v40, 0.0 }
  0xca   :  { %v3189_v41 = vpop.f32.mrf.mxu0 }
  0xcb   :  { %v272_v42 = vadd.f32 %v3189_v41, %v3769_v37  ;;  %v579_v44 = vmul.f32 0.01, %v261_v39  ;;  %vm515_vm3 = vcmp.gt.f32.partialorder %v261_v39, 0.0  ;;  %v645_v56 = vsel %vm517_vm4, %v269_v40, %v581_v48 }
  0xcc   :  { %v263_v43 = vpop.f32.mrf.mxu0 }
  0xcd   :  { %vm518_vm2 = vcmp.gt.f32.partialorder %v272_v42, 0.0  ;;  %v582_v45 = vmul.f32 0.01, %v272_v42  ;;  %v264_v46 = vadd.f32 %v3769_v37, %v263_v43  ;;  %v643_v54 = vsel %vm515_vm3, %v261_v39, %v579_v44 }
  0xce   :  { %v3192_v49 = vpop.f32.mrf.mxu0 }
  0xcf   :  { %v580_v50 = vmul.f32 0.01, %v264_v46  ;;  %vm516_vm5 = vcmp.gt.f32.partialorder %v264_v46, 0.0  ;;  %v646_v51 = vsel %vm518_vm2, %v272_v42, %v582_v45  ;;  %v285_v57 = vadd.f32 %v3192_v49, %v3769_v37 }
  0xd0   :  { %v276_v52 = vpop.f32.mrf.mxu0  ;;  %v708_v60 = vpack.c.bf16 %v646_v51, %v645_v56 }
  0xd1   :  { %v277_v53 = vadd.f32 %v3769_v37, %v276_v52  ;;  %v644_v55 = vsel %vm516_vm5, %v264_v46, %v580_v50  ;;  %v585_v2 = vmul.f32 0.01, %v285_v57  ;;  %vm521_vm9 = vcmp.gt.f32.partialorder %v285_v57, 0.0 }
  0xd2   :  { %v3193_v58 = vpop.f32.mrf.mxu0  ;;  %v707_v59 = vpack.c.bf16 %v644_v55, %v643_v54 }
  0xd3   :  { %v288_v61 = vadd.f32 %v3193_v58, %v3769_v37  ;;  %v583_v63 = vmul.f32 0.01, %v277_v53  ;;  %vm519_vm8 = vcmp.gt.f32.partialorder %v277_v53, 0.0  ;;  %v649_v10 = vsel %vm521_vm9, %v285_v57, %v585_v2 }
  0xd4   :  { %v279_v62 = vpop.f32.mrf.mxu0  ;;  %3254 = vmatprep.mubr.msk.bf16.mxu1 %vm760_vm6, %v707_v59 }
  0xd5   :  { %vm522_vm7 = vcmp.gt.f32.partialorder %v288_v61, 0.0  ;;  %v586_v0 = vmul.f32 0.01, %v288_v61  ;;  %v280_v1 = vadd.f32 %v3769_v37, %v279_v62  ;;  %3255 = vmatmul.mubr.msk.bf16.vlgmr.msra.gmra.mxu1 %vm760_vm6, %v708_v60  ;;  %v647_v7 = vsel %vm519_vm8, %v277_v53, %v583_v63 }
  0xd6   :  { %v3196_v3 = vpop.f32.mrf.mxu0 }
  0xd7   :  { %vm520_vm10 = vcmp.gt.f32.partialorder %v280_v1, 0.0  ;;  %v584_v4 = vmul.f32 0.01, %v280_v1  ;;  %v650_v5 = vsel %vm522_vm7, %v288_v61, %v586_v0  ;;  %v301_v12 = vadd.f32 %v3196_v3, %v3769_v37 }
  0xd8   :  { %v292_v6 = vpop.f32.mrf.mxu0  ;;  %v710_v14 = vpack.c.bf16 %v650_v5, %v649_v10 }
  0xd9   :  { %v648_v8 = vsel %vm520_vm10, %v280_v1, %v584_v4  ;;  %v293_v9 = vadd.f32 %v3769_v37, %v292_v6  ;;  %v589_v20 = vmul.f32 0.01, %v301_v12  ;;  %vm525_vm13 = vcmp.gt.f32.partialorder %v301_v12, 0.0 }
  0xda   :  { %v709_v11 = vpack.c.bf16 %v648_v8, %v647_v7  ;;  %v3197_v13 = vpop.f32.mrf.mxu0 }
  0xdb   :  { %v304_v15 = vadd.f32 %v3197_v13, %v3769_v37  ;;  %v587_v17 = vmul.f32 0.01, %v293_v9  ;;  %vm523_vm12 = vcmp.gt.f32.partialorder %v293_v9, 0.0  ;;  %v653_v28 = vsel %vm525_vm13, %v301_v12, %v589_v20 }
  0xdc   :  { %v295_v16 = vpop.f32.mrf.mxu0  ;;  %3258 = vmatprep.mubr.msk.bf16.mxu1 %vm760_vm6, %v709_v11 }
  0xdd   :  { %vm526_vm11 = vcmp.gt.f32.partialorder %v304_v15, 0.0  ;;  %v590_v18 = vmul.f32 0.01, %v304_v15  ;;  %v296_v19 = vadd.f32 %v3769_v37, %v295_v16  ;;  %3259 = vmatmul.mubr.msk.bf16.gmra.mxu1 %vm760_vm6, %v710_v14  ;;  %v651_v25 = vsel %vm523_vm12, %v293_v9, %v587_v17 }
  0xde   :  { %v3200_v21 = vpop.f32.mrf.mxu0 }
  0xdf   :  { %vm524_vm14 = vcmp.gt.f32.partialorder %v296_v19, 0.0  ;;  %v588_v22 = vmul.f32 0.01, %v296_v19  ;;  %v654_v23 = vsel %vm526_vm11, %v304_v15, %v590_v18  ;;  %v317_v30 = vadd.f32 %v3200_v21, %v3769_v37 }
  0xe0   :  { %v308_v24 = vpop.f32.mrf.mxu0  ;;  %v712_v32 = vpack.c.bf16 %v654_v23, %v653_v28 }
  0xe1   :  { %v652_v26 = vsel %vm524_vm14, %v296_v19, %v588_v22  ;;  %v309_v27 = vadd.f32 %v3769_v37, %v308_v24  ;;  %v593_v39 = vmul.f32 0.01, %v317_v30  ;;  %vm529_vm1 = vcmp.gt.f32.partialorder %v317_v30, 0.0 }
  0xe2   :  { %v711_v29 = vpack.c.bf16 %v652_v26, %v651_v25  ;;  %v3201_v31 = vpop.f32.mrf.mxu0 }
  0xe3   :  { %v320_v33 = vadd.f32 %v3201_v31, %v3769_v37  ;;  %v591_v35 = vmul.f32 0.01, %v309_v27  ;;  %vm527_vm0 = vcmp.gt.f32.partialorder %v309_v27, 0.0  ;;  %v657_v47 = vsel %vm529_vm1, %v317_v30, %v593_v39 }
  0xe4   :  { %v311_v34 = vpop.f32.mrf.mxu0  ;;  %3262 = vmatprep.mubr.msk.bf16.mxu1 %vm760_vm6, %v711_v29 }
  0xe5   :  { %vm530_vm15 = vcmp.gt.f32.partialorder %v320_v33, 0.0  ;;  %v594_v36 = vmul.f32 0.01, %v320_v33  ;;  %v312_v38 = vadd.f32 %v3769_v37, %v311_v34  ;;  %3263 = vmatmul.mubr.msk.bf16.gmra.mxu1 %vm760_vm6, %v712_v32  ;;  %v655_v44 = vsel %vm527_vm0, %v309_v27, %v591_v35 }
  0xe6   :  { %v3204_v40 = vpop.f32.mrf.mxu0 }
  0xe7   :  { %vm528_vm2 = vcmp.gt.f32.partialorder %v312_v38, 0.0  ;;  %v592_v41 = vmul.f32 0.01, %v312_v38  ;;  %v658_v42 = vsel %vm530_vm15, %v320_v33, %v594_v36  ;;  %v333_v49 = vadd.f32 %v3204_v40, %v3769_v37 }
  0xe8   :  { %v324_v43 = vpop.f32.mrf.mxu0  ;;  %v714_v51 = vpack.c.bf16 %v658_v42, %v657_v47 }
  0xe9   :  { %v656_v45 = vsel %vm528_vm2, %v312_v38, %v592_v41  ;;  %v325_v46 = vadd.f32 %v3769_v37, %v324_v43  ;;  %v597_v57 = vmul.f32 0.01, %v333_v49  ;;  %vm533_vm5 = vcmp.gt.f32.partialorder %v333_v49, 0.0 }
  0xea   :  { %v713_v48 = vpack.c.bf16 %v656_v45, %v655_v44  ;;  %v3205_v50 = vpop.f32.mrf.mxu0 }
  0xeb   :  { %v336_v52 = vadd.f32 %v3205_v50, %v3769_v37  ;;  %v595_v54 = vmul.f32 0.01, %v325_v46  ;;  %vm531_vm4 = vcmp.gt.f32.partialorder %v325_v46, 0.0  ;;  %v661_v1 = vsel %vm533_vm5, %v333_v49, %v597_v57 }
  0xec   :  { %v327_v53 = vpop.f32.mrf.mxu0  ;;  %3266 = vmatprep.mubr.msk.bf16.mxu1 %vm760_vm6, %v713_v48 }
  0xed   :  { %vm534_vm3 = vcmp.gt.f32.partialorder %v336_v52, 0.0  ;;  %v598_v55 = vmul.f32 0.01, %v336_v52  ;;  %v328_v56 = vadd.f32 %v3769_v37, %v327_v53  ;;  %3267 = vmatmul.mubr.msk.bf16.gmra.mxu1 %vm760_vm6, %v714_v51  ;;  %v659_v62 = vsel %vm531_vm4, %v325_v46, %v595_v54 }
  0xee   :  { %v3208_v58 = vpop.f32.mrf.mxu0 }
  0xef   :  { %vm532_vm7 = vcmp.gt.f32.partialorder %v328_v56, 0.0  ;;  %v596_v59 = vmul.f32 0.01, %v328_v56  ;;  %v662_v60 = vsel %vm534_vm3, %v336_v52, %v598_v55  ;;  %v349_v3 = vadd.f32 %v3208_v58, %v3769_v37 }
  0xf0   :  { %v340_v61 = vpop.f32.mrf.mxu0  ;;  %v716_v5 = vpack.c.bf16 %v662_v60, %v661_v1 }
  0xf1   :  { %v660_v63 = vsel %vm532_vm7, %v328_v56, %v596_v59  ;;  %v341_v0 = vadd.f32 %v3769_v37, %v340_v61  ;;  %v601_v11 = vmul.f32 0.01, %v349_v3  ;;  %vm537_vm10 = vcmp.gt.f32.partialorder %v349_v3, 0.0 }
  0xf2   :  { %v715_v2 = vpack.c.bf16 %v660_v63, %v659_v62  ;;  %v3209_v4 = vpop.f32.mrf.mxu0 }
  0xf3   :  { %v352_v6 = vadd.f32 %v3209_v4, %v3769_v37  ;;  %v599_v8 = vmul.f32 0.01, %v341_v0  ;;  %vm535_vm9 = vcmp.gt.f32.partialorder %v341_v0, 0.0  ;;  %v665_v19 = vsel %vm537_vm10, %v349_v3, %v601_v11 }
  0xf4   :  { %v343_v7 = vpop.f32.mrf.mxu0  ;;  %3270 = vmatprep.mubr.msk.bf16.mxu1 %vm760_vm6, %v715_v2 }
  0xf5   :  { %vm538_vm8 = vcmp.gt.f32.partialorder %v352_v6, 0.0  ;;  %v602_v9 = vmul.f32 0.01, %v352_v6  ;;  %v344_v10 = vadd.f32 %v3769_v37, %v343_v7  ;;  %3271 = vmatmul.mubr.msk.bf16.gmra.mxu1 %vm760_vm6, %v716_v5  ;;  %v663_v16 = vsel %vm535_vm9, %v341_v0, %v599_v8 }
  0xf6   :  { %v3212_v12 = vpop.f32.mrf.mxu0 }
  0xf7   :  { %vm536_vm11 = vcmp.gt.f32.partialorder %v344_v10, 0.0  ;;  %v600_v13 = vmul.f32 0.01, %v344_v10  ;;  %v666_v14 = vsel %vm538_vm8, %v352_v6, %v602_v9  ;;  %v365_v21 = vadd.f32 %v3212_v12, %v3769_v37 }
  0xf8   :  { %v356_v15 = vpop.f32.mrf.mxu0  ;;  %v718_v23 = vpack.c.bf16 %v666_v14, %v665_v19 }
  0xf9   :  { %v664_v17 = vsel %vm536_vm11, %v344_v10, %v600_v13  ;;  %v357_v18 = vadd.f32 %v3769_v37, %v356_v15  ;;  %v605_v29 = vmul.f32 0.01, %v365_v21  ;;  %vm541_vm14 = vcmp.gt.f32.partialorder %v365_v21, 0.0 }
  0xfa   :  { %v717_v20 = vpack.c.bf16 %v664_v17, %v663_v16  ;;  %v3213_v22 = vpop.f32.mrf.mxu0 }
  0xfb   :  { %v368_v24 = vadd.f32 %v3213_v22, %v3769_v37  ;;  %v603_v26 = vmul.f32 0.01, %v357_v18  ;;  %vm539_vm13 = vcmp.gt.f32.partialorder %v357_v18, 0.0  ;;  %v669_v38 = vsel %vm541_vm14, %v365_v21, %v605_v29 }
  0xfc   :  { %v359_v25 = vpop.f32.mrf.mxu0  ;;  %3274 = vmatprep.mubr.msk.bf16.mxu1 %vm760_vm6, %v717_v20 }
  0xfd   :  { %vm542_vm12 = vcmp.gt.f32.partialorder %v368_v24, 0.0  ;;  %v606_v27 = vmul.f32 0.01, %v368_v24  ;;  %v360_v28 = vadd.f32 %v3769_v37, %v359_v25  ;;  %3275 = vmatmul.mubr.msk.bf16.gmra.mxu1 %vm760_vm6, %v718_v23  ;;  %v667_v34 = vsel %vm539_vm13, %v357_v18, %v603_v26 }
  0xfe   :  { %v3216_v30 = vpop.f32.mrf.mxu0 }
  0xff   :  { %vm540_vm15 = vcmp.gt.f32.partialorder %v360_v28, 0.0  ;;  %v604_v31 = vmul.f32 0.01, %v360_v28  ;;  %v670_v32 = vsel %vm542_vm12, %v368_v24, %v606_v27  ;;  %v381_v40 = vadd.f32 %v3216_v30, %v3769_v37 }
 0x100   :  { %v372_v33 = vpop.f32.mrf.mxu0  ;;  %v720_v42 = vpack.c.bf16 %v670_v32, %v669_v38 }
 0x101   :  { %v668_v35 = vsel %vm540_vm15, %v360_v28, %v604_v31  ;;  %v373_v36 = vadd.f32 %v3769_v37, %v372_v33  ;;  %v609_v48 = vmul.f32 0.01, %v381_v40  ;;  %vm545_vm2 = vcmp.gt.f32.partialorder %v381_v40, 0.0 }
 0x102   :  { %v719_v39 = vpack.c.bf16 %v668_v35, %v667_v34  ;;  %v3217_v41 = vpop.f32.mrf.mxu0 }
 0x103   :  { %v384_v43 = vadd.f32 %v3217_v41, %v3769_v37  ;;  %v607_v45 = vmul.f32 0.01, %v373_v36  ;;  %vm543_vm1 = vcmp.gt.f32.partialorder %v373_v36, 0.0  ;;  %v673_v56 = vsel %vm545_vm2, %v381_v40, %v609_v48  ;;  %v3476_v41 = vld [vmem:[%s4387_s2 + $0x10] sm:$0xff]  }
 0x104   :  { %v375_v44 = vpop.f32.mrf.mxu0  ;;  %3278 = vmatprep.mubr.msk.bf16.mxu1 %vm760_vm6, %v719_v39  ;;  %3320 = vmatprep.subr.bf16.mxu0 %v3476_v41 }
 0x105   :  { %vm546_vm0 = vcmp.gt.f32.partialorder %v384_v43, 0.0  ;;  %v610_v46 = vmul.f32 0.01, %v384_v43  ;;  %v376_v47 = vadd.f32 %v3769_v37, %v375_v44  ;;  %3279 = vmatmul.mubr.msk.bf16.gmra.mxu1 %vm760_vm6, %v720_v42  ;;  %v671_v53 = vsel %vm543_vm1, %v373_v36, %v607_v45  ;;  %3321 = vmatpush3.bf16.msra.mxu0 %v3476_v41 }
 0x106   :  { %v3220_v49 = vpop.f32.mrf.mxu0 }
 0x107   :  { %vm544_vm3 = vcmp.gt.f32.partialorder %v376_v47, 0.0  ;;  %v608_v50 = vmul.f32 0.01, %v376_v47  ;;  %v674_v51 = vsel %vm546_vm0, %v384_v43, %v610_v46  ;;  %v397_v58 = vadd.f32 %v3220_v49, %v3769_v37 }
 0x108   :  { %v388_v52 = vpop.f32.mrf.mxu0  ;;  %v722_v60 = vpack.c.bf16 %v674_v51, %v673_v56 }
 0x109   :  { %v672_v54 = vsel %vm544_vm3, %v376_v47, %v608_v50  ;;  %v389_v55 = vadd.f32 %v3769_v37, %v388_v52  ;;  %v613_v2 = vmul.f32 0.01, %v397_v58  ;;  %vm549_vm7 = vcmp.gt.f32.partialorder %v397_v58, 0.0 }
 0x10a   :  { %v721_v57 = vpack.c.bf16 %v672_v54, %v671_v53  ;;  %v3221_v59 = vpop.f32.mrf.mxu0 }
 0x10b   :  { %v400_v61 = vadd.f32 %v3221_v59, %v3769_v37  ;;  %v611_v63 = vmul.f32 0.01, %v389_v55  ;;  %vm547_vm5 = vcmp.gt.f32.partialorder %v389_v55, 0.0  ;;  %v677_v10 = vsel %vm549_vm7, %v397_v58, %v613_v2 }
 0x10c   :  { %v391_v62 = vpop.f32.mrf.mxu0  ;;  %3282 = vmatprep.mubr.msk.bf16.mxu1 %vm760_vm6, %v721_v57 }
 0x10d   :  { %vm550_vm4 = vcmp.gt.f32.partialorder %v400_v61, 0.0  ;;  %v614_v0 = vmul.f32 0.01, %v400_v61  ;;  %v392_v1 = vadd.f32 %v3769_v37, %v391_v62  ;;  %3283 = vmatmul.mubr.msk.bf16.gmra.mxu1 %vm760_vm6, %v722_v60  ;;  %v675_v7 = vsel %vm547_vm5, %v389_v55, %v611_v63 }
 0x10e   :  { %v3224_v3 = vpop.f32.mrf.mxu0 }
 0x10f   :  { %vm548_vm8 = vcmp.gt.f32.partialorder %v392_v1, 0.0  ;;  %v612_v4 = vmul.f32 0.01, %v392_v1  ;;  %v678_v5 = vsel %vm550_vm4, %v400_v61, %v614_v0  ;;  %v413_v12 = vadd.f32 %v3224_v3, %v3769_v37 }
 0x110   :  { %v404_v6 = vpop.f32.mrf.mxu0  ;;  %v724_v14 = vpack.c.bf16 %v678_v5, %v677_v10 }
 0x111   :  { %v676_v8 = vsel %vm548_vm8, %v392_v1, %v612_v4  ;;  %v405_v9 = vadd.f32 %v3769_v37, %v404_v6  ;;  %v617_v20 = vmul.f32 0.01, %v413_v12  ;;  %vm553_vm11 = vcmp.gt.f32.partialorder %v413_v12, 0.0 }
 0x112   :  { %v723_v11 = vpack.c.bf16 %v676_v8, %v675_v7  ;;  %v3225_v13 = vpop.f32.mrf.mxu0 }
 0x113   :  { %v416_v15 = vadd.f32 %v3225_v13, %v3769_v37  ;;  %v615_v17 = vmul.f32 0.01, %v405_v9  ;;  %vm551_vm10 = vcmp.gt.f32.partialorder %v405_v9, 0.0  ;;  %v681_v28 = vsel %vm553_vm11, %v413_v12, %v617_v20 }
 0x114   :  { %v407_v16 = vpop.f32.mrf.mxu0  ;;  %3286 = vmatprep.mubr.msk.bf16.mxu1 %vm760_vm6, %v723_v11 }
 0x115   :  { %vm554_vm9 = vcmp.gt.f32.partialorder %v416_v15, 0.0  ;;  %v618_v18 = vmul.f32 0.01, %v416_v15  ;;  %v408_v19 = vadd.f32 %v3769_v37, %v407_v16  ;;  %3287 = vmatmul.mubr.msk.bf16.gmra.mxu1 %vm760_vm6, %v724_v14  ;;  %v679_v25 = vsel %vm551_vm10, %v405_v9, %v615_v17 }
 0x116   :  { %v3228_v21 = vpop.f32.mrf.mxu0 }
 0x117   :  { %vm552_vm12 = vcmp.gt.f32.partialorder %v408_v19, 0.0  ;;  %v616_v22 = vmul.f32 0.01, %v408_v19  ;;  %v682_v23 = vsel %vm554_vm9, %v416_v15, %v618_v18  ;;  %v429_v30 = vadd.f32 %v3228_v21, %v3769_v37 }
 0x118   :  { %v420_v24 = vpop.f32.mrf.mxu0  ;;  %v726_v32 = vpack.c.bf16 %v682_v23, %v681_v28 }
 0x119   :  { %v680_v26 = vsel %vm552_vm12, %v408_v19, %v616_v22  ;;  %v421_v27 = vadd.f32 %v3769_v37, %v420_v24  ;;  %v621_v39 = vmul.f32 0.01, %v429_v30  ;;  %vm557_vm15 = vcmp.gt.f32.partialorder %v429_v30, 0.0 }
 0x11a   :  { %v725_v29 = vpack.c.bf16 %v680_v26, %v679_v25  ;;  %v3229_v31 = vpop.f32.mrf.mxu0 }
 0x11b   :  { %v432_v33 = vadd.f32 %v3229_v31, %v3769_v37  ;;  %v619_v35 = vmul.f32 0.01, %v421_v27  ;;  %vm555_vm14 = vcmp.gt.f32.partialorder %v421_v27, 0.0  ;;  %v685_v48 = vsel %vm557_vm15, %v429_v30, %v621_v39 }
 0x11c   :  { %v423_v34 = vpop.f32.mrf.mxu0  ;;  %3290 = vmatprep.mubr.msk.bf16.mxu1 %vm760_vm6, %v725_v29 }
 0x11d   :  { %vm558_vm13 = vcmp.gt.f32.partialorder %v432_v33, 0.0  ;;  %v622_v36 = vmul.f32 0.01, %v432_v33  ;;  %v424_v38 = vadd.f32 %v3769_v37, %v423_v34  ;;  %3291 = vmatmul.mubr.msk.bf16.gmra.mxu1 %vm760_vm6, %v726_v32  ;;  %v683_v45 = vsel %vm555_vm14, %v421_v27, %v619_v35 }
 0x11e   :  { %v3232_v40 = vpop.f32.mrf.mxu0 }
 0x11f   :  { %vm556_vm0 = vcmp.gt.f32.partialorder %v424_v38, 0.0  ;;  %v620_v42 = vmul.f32 0.01, %v424_v38  ;;  %v686_v43 = vsel %vm558_vm13, %v432_v33, %v622_v36  ;;  %v445_v50 = vadd.f32 %v3232_v40, %v3769_v37 }
 0x120   :  { %v436_v44 = vpop.f32.mrf.mxu0  ;;  %v728_v52 = vpack.c.bf16 %v686_v43, %v685_v48 }
 0x121   :  { %v684_v46 = vsel %vm556_vm0, %v424_v38, %v620_v42  ;;  %v437_v47 = vadd.f32 %v3769_v37, %v436_v44  ;;  %v625_v58 = vmul.f32 0.01, %v445_v50  ;;  %vm561_vm3 = vcmp.gt.f32.partialorder %v445_v50, 0.0 }
 0x122   :  { %v727_v49 = vpack.c.bf16 %v684_v46, %v683_v45  ;;  %v3233_v51 = vpop.f32.mrf.mxu0 }
 0x123   :  { %v448_v53 = vadd.f32 %v3233_v51, %v3769_v37  ;;  %v623_v55 = vmul.f32 0.01, %v437_v47  ;;  %vm559_vm2 = vcmp.gt.f32.partialorder %v437_v47, 0.0  ;;  %v689_v2 = vsel %vm561_vm3, %v445_v50, %v625_v58 }
 0x124   :  { %v439_v54 = vpop.f32.mrf.mxu0  ;;  %3294 = vmatprep.mubr.msk.bf16.mxu1 %vm760_vm6, %v727_v49 }
 0x125   :  { %vm562_vm1 = vcmp.gt.f32.partialorder %v448_v53, 0.0  ;;  %v626_v56 = vmul.f32 0.01, %v448_v53  ;;  %v440_v57 = vadd.f32 %v3769_v37, %v439_v54  ;;  %3295 = vmatmul.mubr.msk.bf16.gmra.mxu1 %vm760_vm6, %v728_v52  ;;  %v687_v63 = vsel %vm559_vm2, %v437_v47, %v623_v55 }
 0x126   :  { %v3236_v59 = vpop.f32.mrf.mxu0 }
 0x127   :  { %vm560_vm4 = vcmp.gt.f32.partialorder %v440_v57, 0.0  ;;  %v624_v60 = vmul.f32 0.01, %v440_v57  ;;  %v690_v61 = vsel %vm562_vm1, %v448_v53, %v626_v56  ;;  %v461_v4 = vadd.f32 %v3236_v59, %v3769_v37 }
 0x128   :  { %v452_v62 = vpop.f32.mrf.mxu0  ;;  %v730_v6 = vpack.c.bf16 %v690_v61, %v689_v2 }
 0x129   :  { %v688_v0 = vsel %vm560_vm4, %v440_v57, %v624_v60  ;;  %v453_v1 = vadd.f32 %v3769_v37, %v452_v62  ;;  %v629_v12 = vmul.f32 0.01, %v461_v4  ;;  %vm565_vm8 = vcmp.gt.f32.partialorder %v461_v4, 0.0 }
 0x12a   :  { %v729_v3 = vpack.c.bf16 %v688_v0, %v687_v63  ;;  %v3237_v5 = vpop.f32.mrf.mxu0 }
 0x12b   :  { %v464_v7 = vadd.f32 %v3237_v5, %v3769_v37  ;;  %v627_v9 = vmul.f32 0.01, %v453_v1  ;;  %vm563_vm7 = vcmp.gt.f32.partialorder %v453_v1, 0.0  ;;  %v693_v20 = vsel %vm565_vm8, %v461_v4, %v629_v12 }
 0x12c   :  { %v455_v8 = vpop.f32.mrf.mxu0  ;;  %3298 = vmatprep.mubr.msk.bf16.mxu1 %vm760_vm6, %v729_v3 }
 0x12d   :  { %vm566_vm5 = vcmp.gt.f32.partialorder %v464_v7, 0.0  ;;  %v630_v10 = vmul.f32 0.01, %v464_v7  ;;  %v456_v11 = vadd.f32 %v3769_v37, %v455_v8  ;;  %3299 = vmatmul.mubr.msk.bf16.gmra.mxu1 %vm760_vm6, %v730_v6  ;;  %v691_v17 = vsel %vm563_vm7, %v453_v1, %v627_v9 }
 0x12e   :  { %v3240_v13 = vpop.f32.mrf.mxu0 }
 0x12f   :  { %vm564_vm9 = vcmp.gt.f32.partialorder %v456_v11, 0.0  ;;  %v628_v14 = vmul.f32 0.01, %v456_v11  ;;  %v694_v15 = vsel %vm566_vm5, %v464_v7, %v630_v10  ;;  %v477_v22 = vadd.f32 %v3240_v13, %v3769_v37 }
 0x130   :  { %v468_v16 = vpop.f32.mrf.mxu0  ;;  %v732_v24 = vpack.c.bf16 %v694_v15, %v693_v20 }
 0x131   :  { %v692_v18 = vsel %vm564_vm9, %v456_v11, %v628_v14  ;;  %v469_v19 = vadd.f32 %v3769_v37, %v468_v16  ;;  %v633_v30 = vmul.f32 0.01, %v477_v22  ;;  %vm569_vm12 = vcmp.gt.f32.partialorder %v477_v22, 0.0 }
 0x132   :  { %v731_v21 = vpack.c.bf16 %v692_v18, %v691_v17  ;;  %v3241_v23 = vpop.f32.mrf.mxu0 }
 0x133   :  { %v480_v25 = vadd.f32 %v3241_v23, %v3769_v37  ;;  %v631_v27 = vmul.f32 0.01, %v469_v19  ;;  %vm567_vm11 = vcmp.gt.f32.partialorder %v469_v19, 0.0  ;;  %v697_v39 = vsel %vm569_vm12, %v477_v22, %v633_v30 }
 0x134   :  { %v471_v26 = vpop.f32.mrf.mxu0  ;;  %3302 = vmatprep.mubr.msk.bf16.mxu1 %vm760_vm6, %v731_v21  ;;  %v3477_v21 = vld [vmem:[%s4387_s2 + $0x28] sm:$0xff]  }
 0x135   :  { %vm570_vm10 = vcmp.gt.f32.partialorder %v480_v25, 0.0  ;;  %v634_v28 = vmul.f32 0.01, %v480_v25  ;;  %v472_v29 = vadd.f32 %v3769_v37, %v471_v26  ;;  %3303 = vmatmul.mubr.msk.bf16.gmra.mxu1 %vm760_vm6, %v732_v24  ;;  %v695_v35 = vsel %vm567_vm11, %v469_v19, %v631_v27  ;;  %3386 = vmatprep.subr.bf16.mxu1 %v3477_v21 }
 0x136   :  { %v3244_v31 = vpop.f32.mrf.mxu0  ;;  %3387 = vmatpush3.bf16.msra.mxu1 %v3477_v21 }
 0x137   :  { %vm568_vm13 = vcmp.gt.f32.partialorder %v472_v29, 0.0  ;;  %v632_v32 = vmul.f32 0.01, %v472_v29  ;;  %v698_v33 = vsel %vm570_vm10, %v480_v25, %v634_v28  ;;  %v493_v41 = vadd.f32 %v3244_v31, %v3769_v37 }
 0x138   :  { %v484_v34 = vpop.f32.mrf.mxu0  ;;  %v734_v43 = vpack.c.bf16 %v698_v33, %v697_v39 }
 0x139   :  { %v696_v36 = vsel %vm568_vm13, %v472_v29, %v632_v32  ;;  %v485_v38 = vadd.f32 %v3769_v37, %v484_v34  ;;  %v637_v49 = vmul.f32 0.01, %v493_v41  ;;  %vm573_vm0 = vcmp.gt.f32.partialorder %v493_v41, 0.0 }
 0x13a   :  { %v733_v40 = vpack.c.bf16 %v696_v36, %v695_v35  ;;  %v3245_v42 = vpop.f32.mrf.mxu0 }
 0x13b   :  { %v496_v44 = vadd.f32 %v3245_v42, %v3769_v37  ;;  %v635_v46 = vmul.f32 0.01, %v485_v38  ;;  %vm571_vm15 = vcmp.gt.f32.partialorder %v485_v38, 0.0  ;;  %v701_v57 = vsel %vm573_vm0, %v493_v41, %v637_v49 }
 0x13c   :  { %v487_v45 = vpop.f32.mrf.mxu0  ;;  %3306 = vmatprep.mubr.msk.bf16.mxu1 %vm760_vm6, %v733_v40 }
 0x13d   :  { %vm574_vm14 = vcmp.gt.f32.partialorder %v496_v44, 0.0  ;;  %v638_v47 = vmul.f32 0.01, %v496_v44  ;;  %v488_v48 = vadd.f32 %v3769_v37, %v487_v45  ;;  %3307 = vmatmul.mubr.msk.bf16.gmra.mxu1 %vm760_vm6, %v734_v43  ;;  %v699_v54 = vsel %vm571_vm15, %v485_v38, %v635_v46 }
 0x13e   :  { %v3248_v50 = vpop.f32.mrf.mxu0 }
 0x13f   :  { %vm572_vm1 = vcmp.gt.f32.partialorder %v488_v48, 0.0  ;;  %v636_v51 = vmul.f32 0.01, %v488_v48  ;;  %v702_v52 = vsel %vm574_vm14, %v496_v44, %v638_v47  ;;  %v509_v59 = vadd.f32 %v3248_v50, %v3769_v37 }
 0x140   :  { %v500_v53 = vpop.f32.mrf.mxu0  ;;  %v736_v61 = vpack.c.bf16 %v702_v52, %v701_v57 }
 0x141   :  { %v700_v55 = vsel %vm572_vm1, %v488_v48, %v636_v51  ;;  %v501_v56 = vadd.f32 %v3769_v37, %v500_v53  ;;  %v641_v3 = vmul.f32 0.01, %v509_v59  ;;  %vm577_vm4 = vcmp.gt.f32.partialorder %v509_v59, 0.0 }
 0x142   :  { %v735_v58 = vpack.c.bf16 %v700_v55, %v699_v54  ;;  %v3249_v60 = vpop.f32.mrf.mxu0 }
 0x143   :  { %v512_v62 = vadd.f32 %v3249_v60, %v3769_v37  ;;  %v639_v0 = vmul.f32 0.01, %v501_v56  ;;  %vm575_vm3 = vcmp.gt.f32.partialorder %v501_v56, 0.0  ;;  %v705_v8 = vsel %vm577_vm4, %v509_v59, %v641_v3 }
 0x144   :  { %v503_v63 = vpop.f32.mrf.mxu0  ;;  %3310 = vmatprep.mubr.msk.bf16.mxu1 %vm760_vm6, %v735_v58 }
 0x145   :  { %vm578_vm2 = vcmp.gt.f32.partialorder %v512_v62, 0.0  ;;  %v642_v1 = vmul.f32 0.01, %v512_v62  ;;  %v504_v2 = vadd.f32 %v3769_v37, %v503_v63  ;;  %3311 = vmatmul.mubr.msk.bf16.gmra.mxu1 %vm760_vm6, %v736_v61  ;;  %v703_v6 = vsel %vm575_vm3, %v501_v56, %v639_v0  ;;  %v3876_v37 = vld [vmem:[%s4388_s3 + $0x1] ss:$0 sm:$0xff] }
 0x147   :  { %vm576_vm5 = vcmp.gt.f32.partialorder %v504_v2, 0.0  ;;  %v640_v4 = vmul.f32 0.01, %v504_v2  ;;  %v706_v5 = vsel %vm578_vm2, %v512_v62, %v642_v1 }
 0x148   :  { %v738_v10 = vpack.c.bf16 %v706_v5, %v705_v8 }
 0x149   :  { %v704_v7 = vsel %vm576_vm5, %v504_v2, %v640_v4 }
 0x14a   :  { %v737_v9 = vpack.c.bf16 %v704_v7, %v703_v6 }
 0x14c   :  { %3314 = vmatprep.mubr.msk.bf16.mxu1 %vm760_vm6, %v737_v9 }
 0x14d   :  { %3315 = vmatmul.mubr.msk.bf16.gmra.mxu1 %vm760_vm6, %v738_v10 }
 0x195   :  { %v3256_v11 = vpop.f32.mrf.mxu1 }
 0x196   :  { %v900_v14 = vadd.f32 %v3256_v11, %v3876_v37 }
 0x197   :  { %v891_v12 = vpop.f32.mrf.mxu1 }
 0x198   :  { %v892_v13 = vadd.f32 %v3876_v37, %v891_v12  ;;  %v1212_v22 = vmul.f32 0.01, %v900_v14  ;;  %vm1148_vm9 = vcmp.gt.f32.partialorder %v900_v14, 0.0 }
 0x199   :  { %v3257_v15 = vpop.f32.mrf.mxu1 }
 0x19a   :  { %v903_v16 = vadd.f32 %v3257_v15, %v3876_v37  ;;  %v1210_v18 = vmul.f32 0.01, %v892_v13  ;;  %vm1146_vm8 = vcmp.gt.f32.partialorder %v892_v13, 0.0  ;;  %v1276_v30 = vsel %vm1148_vm9, %v900_v14, %v1212_v22 }
 0x19b   :  { %v894_v17 = vpop.f32.mrf.mxu1 }
 0x19c   :  { %vm1149_vm7 = vcmp.gt.f32.partialorder %v903_v16, 0.0  ;;  %v1213_v19 = vmul.f32 0.01, %v903_v16  ;;  %v895_v20 = vadd.f32 %v3876_v37, %v894_v17  ;;  %v1274_v27 = vsel %vm1146_vm8, %v892_v13, %v1210_v18 }
 0x19d   :  { %v3260_v23 = vpop.f32.mrf.mxu1 }
 0x19e   :  { %vm1147_vm10 = vcmp.gt.f32.partialorder %v895_v20, 0.0  ;;  %v1211_v24 = vmul.f32 0.01, %v895_v20  ;;  %v1277_v25 = vsel %vm1149_vm7, %v903_v16, %v1213_v19  ;;  %v916_v32 = vadd.f32 %v3260_v23, %v3876_v37 }
 0x19f   :  { %v907_v26 = vpop.f32.mrf.mxu1  ;;  %v1339_v34 = vpack.c.bf16 %v1277_v25, %v1276_v30 }
 0x1a0   :  { %v1275_v28 = vsel %vm1147_vm10, %v895_v20, %v1211_v24  ;;  %v908_v29 = vadd.f32 %v3876_v37, %v907_v26  ;;  %v1216_v41 = vmul.f32 0.01, %v916_v32  ;;  %vm1152_vm13 = vcmp.gt.f32.partialorder %v916_v32, 0.0 }
 0x1a1   :  { %v1338_v31 = vpack.c.bf16 %v1275_v28, %v1274_v27  ;;  %v3261_v33 = vpop.f32.mrf.mxu1 }
 0x1a2   :  { %v919_v35 = vadd.f32 %v3261_v33, %v3876_v37  ;;  %v1214_v38 = vmul.f32 0.01, %v908_v29  ;;  %vm1150_vm12 = vcmp.gt.f32.partialorder %v908_v29, 0.0  ;;  %v1280_v49 = vsel %vm1152_vm13, %v916_v32, %v1216_v41 }
 0x1a3   :  { %v910_v36 = vpop.f32.mrf.mxu1  ;;  %3322 = vmatprep.mubr.msk.bf16.mxu0 %vm760_vm6, %v1338_v31 }
 0x1a4   :  { %vm1153_vm11 = vcmp.gt.f32.partialorder %v919_v35, 0.0  ;;  %v1217_v39 = vmul.f32 0.01, %v919_v35  ;;  %v911_v40 = vadd.f32 %v3876_v37, %v910_v36  ;;  %3323 = vmatmul.mubr.msk.bf16.vlgmr.msra.gmra.mxu0 %vm760_vm6, %v1339_v34  ;;  %v1278_v46 = vsel %vm1150_vm12, %v908_v29, %v1214_v38 }
 0x1a5   :  { %v3264_v42 = vpop.f32.mrf.mxu1 }
 0x1a6   :  { %vm1151_vm14 = vcmp.gt.f32.partialorder %v911_v40, 0.0  ;;  %v1215_v43 = vmul.f32 0.01, %v911_v40  ;;  %v1281_v44 = vsel %vm1153_vm11, %v919_v35, %v1217_v39  ;;  %v932_v51 = vadd.f32 %v3264_v42, %v3876_v37 }
 0x1a7   :  { %v923_v45 = vpop.f32.mrf.mxu1  ;;  %v1341_v53 = vpack.c.bf16 %v1281_v44, %v1280_v49 }
 0x1a8   :  { %v1279_v47 = vsel %vm1151_vm14, %v911_v40, %v1215_v43  ;;  %v924_v48 = vadd.f32 %v3876_v37, %v923_v45  ;;  %v1220_v59 = vmul.f32 0.01, %v932_v51  ;;  %vm1156_vm1 = vcmp.gt.f32.partialorder %v932_v51, 0.0 }
 0x1a9   :  { %v1340_v50 = vpack.c.bf16 %v1279_v47, %v1278_v46  ;;  %v3265_v52 = vpop.f32.mrf.mxu1 }
 0x1aa   :  { %v935_v54 = vadd.f32 %v3265_v52, %v3876_v37  ;;  %v1218_v56 = vmul.f32 0.01, %v924_v48  ;;  %vm1154_vm0 = vcmp.gt.f32.partialorder %v924_v48, 0.0  ;;  %v1284_v3 = vsel %vm1156_vm1, %v932_v51, %v1220_v59 }
 0x1ab   :  { %v926_v55 = vpop.f32.mrf.mxu1  ;;  %3326 = vmatprep.mubr.msk.bf16.mxu0 %vm760_vm6, %v1340_v50 }
 0x1ac   :  { %vm1157_vm15 = vcmp.gt.f32.partialorder %v935_v54, 0.0  ;;  %v1221_v57 = vmul.f32 0.01, %v935_v54  ;;  %v927_v58 = vadd.f32 %v3876_v37, %v926_v55  ;;  %3327 = vmatmul.mubr.msk.bf16.gmra.mxu0 %vm760_vm6, %v1341_v53  ;;  %v1282_v0 = vsel %vm1154_vm0, %v924_v48, %v1218_v56 }
 0x1ad   :  { %v3268_v60 = vpop.f32.mrf.mxu1 }
 0x1ae   :  { %vm1155_vm2 = vcmp.gt.f32.partialorder %v927_v58, 0.0  ;;  %v1219_v61 = vmul.f32 0.01, %v927_v58  ;;  %v1285_v62 = vsel %vm1157_vm15, %v935_v54, %v1221_v57  ;;  %v948_v5 = vadd.f32 %v3268_v60, %v3876_v37 }
 0x1af   :  { %v939_v63 = vpop.f32.mrf.mxu1  ;;  %v1343_v7 = vpack.c.bf16 %v1285_v62, %v1284_v3 }
 0x1b0   :  { %v1283_v1 = vsel %vm1155_vm2, %v927_v58, %v1219_v61  ;;  %v940_v2 = vadd.f32 %v3876_v37, %v939_v63  ;;  %v1224_v13 = vmul.f32 0.01, %v948_v5  ;;  %vm1160_vm5 = vcmp.gt.f32.partialorder %v948_v5, 0.0 }
 0x1b1   :  { %v1342_v4 = vpack.c.bf16 %v1283_v1, %v1282_v0  ;;  %v3269_v6 = vpop.f32.mrf.mxu1 }
 0x1b2   :  { %v951_v8 = vadd.f32 %v3269_v6, %v3876_v37  ;;  %v1222_v10 = vmul.f32 0.01, %v940_v2  ;;  %vm1158_vm4 = vcmp.gt.f32.partialorder %v940_v2, 0.0  ;;  %v1288_v21 = vsel %vm1160_vm5, %v948_v5, %v1224_v13 }
 0x1b3   :  { %v942_v9 = vpop.f32.mrf.mxu1  ;;  %3330 = vmatprep.mubr.msk.bf16.mxu0 %vm760_vm6, %v1342_v4 }
 0x1b4   :  { %vm1161_vm3 = vcmp.gt.f32.partialorder %v951_v8, 0.0  ;;  %v1225_v11 = vmul.f32 0.01, %v951_v8  ;;  %v943_v12 = vadd.f32 %v3876_v37, %v942_v9  ;;  %3331 = vmatmul.mubr.msk.bf16.gmra.mxu0 %vm760_vm6, %v1343_v7  ;;  %v1286_v18 = vsel %vm1158_vm4, %v940_v2, %v1222_v10 }
 0x1b5   :  { %v3272_v14 = vpop.f32.mrf.mxu1 }
 0x1b6   :  { %vm1159_vm7 = vcmp.gt.f32.partialorder %v943_v12, 0.0  ;;  %v1223_v15 = vmul.f32 0.01, %v943_v12  ;;  %v1289_v16 = vsel %vm1161_vm3, %v951_v8, %v1225_v11  ;;  %v964_v23 = vadd.f32 %v3272_v14, %v3876_v37 }
 0x1b7   :  { %v955_v17 = vpop.f32.mrf.mxu1  ;;  %v1345_v25 = vpack.c.bf16 %v1289_v16, %v1288_v21 }
 0x1b8   :  { %v1287_v19 = vsel %vm1159_vm7, %v943_v12, %v1223_v15  ;;  %v956_v20 = vadd.f32 %v3876_v37, %v955_v17  ;;  %v1228_v31 = vmul.f32 0.01, %v964_v23  ;;  %vm1164_vm10 = vcmp.gt.f32.partialorder %v964_v23, 0.0 }
 0x1b9   :  { %v1344_v22 = vpack.c.bf16 %v1287_v19, %v1286_v18  ;;  %v3273_v24 = vpop.f32.mrf.mxu1 }
 0x1ba   :  { %v967_v26 = vadd.f32 %v3273_v24, %v3876_v37  ;;  %v1226_v28 = vmul.f32 0.01, %v956_v20  ;;  %vm1162_vm9 = vcmp.gt.f32.partialorder %v956_v20, 0.0  ;;  %v1292_v40 = vsel %vm1164_vm10, %v964_v23, %v1228_v31 }
 0x1bb   :  { %v958_v27 = vpop.f32.mrf.mxu1  ;;  %3334 = vmatprep.mubr.msk.bf16.mxu0 %vm760_vm6, %v1344_v22 }
 0x1bc   :  { %vm1165_vm8 = vcmp.gt.f32.partialorder %v967_v26, 0.0  ;;  %v1229_v29 = vmul.f32 0.01, %v967_v26  ;;  %v959_v30 = vadd.f32 %v3876_v37, %v958_v27  ;;  %3335 = vmatmul.mubr.msk.bf16.gmra.mxu0 %vm760_vm6, %v1345_v25  ;;  %v1290_v36 = vsel %vm1162_vm9, %v956_v20, %v1226_v28 }
 0x1bd   :  { %v3276_v32 = vpop.f32.mrf.mxu1 }
 0x1be   :  { %vm1163_vm11 = vcmp.gt.f32.partialorder %v959_v30, 0.0  ;;  %v1227_v33 = vmul.f32 0.01, %v959_v30  ;;  %v1293_v34 = vsel %vm1165_vm8, %v967_v26, %v1229_v29  ;;  %v980_v42 = vadd.f32 %v3276_v32, %v3876_v37 }
 0x1bf   :  { %v971_v35 = vpop.f32.mrf.mxu1  ;;  %v1347_v44 = vpack.c.bf16 %v1293_v34, %v1292_v40 }
 0x1c0   :  { %v1291_v38 = vsel %vm1163_vm11, %v959_v30, %v1227_v33  ;;  %v972_v39 = vadd.f32 %v3876_v37, %v971_v35  ;;  %v1232_v50 = vmul.f32 0.01, %v980_v42  ;;  %vm1168_vm14 = vcmp.gt.f32.partialorder %v980_v42, 0.0 }
 0x1c1   :  { %v1346_v41 = vpack.c.bf16 %v1291_v38, %v1290_v36  ;;  %v3277_v43 = vpop.f32.mrf.mxu1 }
 0x1c2   :  { %v983_v45 = vadd.f32 %v3277_v43, %v3876_v37  ;;  %v1230_v47 = vmul.f32 0.01, %v972_v39  ;;  %vm1166_vm13 = vcmp.gt.f32.partialorder %v972_v39, 0.0  ;;  %v1296_v58 = vsel %vm1168_vm14, %v980_v42, %v1232_v50 }
 0x1c3   :  { %v974_v46 = vpop.f32.mrf.mxu1  ;;  %3338 = vmatprep.mubr.msk.bf16.mxu0 %vm760_vm6, %v1346_v41 }
 0x1c4   :  { %vm1169_vm12 = vcmp.gt.f32.partialorder %v983_v45, 0.0  ;;  %v1233_v48 = vmul.f32 0.01, %v983_v45  ;;  %v975_v49 = vadd.f32 %v3876_v37, %v974_v46  ;;  %3339 = vmatmul.mubr.msk.bf16.gmra.mxu0 %vm760_vm6, %v1347_v44  ;;  %v1294_v55 = vsel %vm1166_vm13, %v972_v39, %v1230_v47 }
 0x1c5   :  { %v3280_v51 = vpop.f32.mrf.mxu1 }
 0x1c6   :  { %vm1167_vm15 = vcmp.gt.f32.partialorder %v975_v49, 0.0  ;;  %v1231_v52 = vmul.f32 0.01, %v975_v49  ;;  %v1297_v53 = vsel %vm1169_vm12, %v983_v45, %v1233_v48  ;;  %v996_v60 = vadd.f32 %v3280_v51, %v3876_v37 }
 0x1c7   :  { %v987_v54 = vpop.f32.mrf.mxu1  ;;  %v1349_v62 = vpack.c.bf16 %v1297_v53, %v1296_v58 }
 0x1c8   :  { %v1295_v56 = vsel %vm1167_vm15, %v975_v49, %v1231_v52  ;;  %v988_v57 = vadd.f32 %v3876_v37, %v987_v54  ;;  %v1236_v4 = vmul.f32 0.01, %v996_v60  ;;  %vm1172_vm2 = vcmp.gt.f32.partialorder %v996_v60, 0.0 }
 0x1c9   :  { %v1348_v59 = vpack.c.bf16 %v1295_v56, %v1294_v55  ;;  %v3281_v61 = vpop.f32.mrf.mxu1 }
 0x1ca   :  { %v999_v63 = vadd.f32 %v3281_v61, %v3876_v37  ;;  %v1234_v1 = vmul.f32 0.01, %v988_v57  ;;  %vm1170_vm1 = vcmp.gt.f32.partialorder %v988_v57, 0.0  ;;  %v1300_v12 = vsel %vm1172_vm2, %v996_v60, %v1236_v4 }
 0x1cb   :  { %v990_v0 = vpop.f32.mrf.mxu1  ;;  %3342 = vmatprep.mubr.msk.bf16.mxu0 %vm760_vm6, %v1348_v59 }
 0x1cc   :  { %vm1173_vm0 = vcmp.gt.f32.partialorder %v999_v63, 0.0  ;;  %v1237_v2 = vmul.f32 0.01, %v999_v63  ;;  %v991_v3 = vadd.f32 %v3876_v37, %v990_v0  ;;  %3343 = vmatmul.mubr.msk.bf16.gmra.mxu0 %vm760_vm6, %v1349_v62  ;;  %v1298_v9 = vsel %vm1170_vm1, %v988_v57, %v1234_v1 }
 0x1cd   :  { %v3284_v5 = vpop.f32.mrf.mxu1 }
 0x1ce   :  { %vm1171_vm3 = vcmp.gt.f32.partialorder %v991_v3, 0.0  ;;  %v1235_v6 = vmul.f32 0.01, %v991_v3  ;;  %v1301_v7 = vsel %vm1173_vm0, %v999_v63, %v1237_v2  ;;  %v1012_v14 = vadd.f32 %v3284_v5, %v3876_v37 }
 0x1cf   :  { %v1003_v8 = vpop.f32.mrf.mxu1  ;;  %v1351_v16 = vpack.c.bf16 %v1301_v7, %v1300_v12 }
 0x1d0   :  { %v1299_v10 = vsel %vm1171_vm3, %v991_v3, %v1235_v6  ;;  %v1004_v11 = vadd.f32 %v3876_v37, %v1003_v8  ;;  %v1240_v22 = vmul.f32 0.01, %v1012_v14  ;;  %vm1176_vm7 = vcmp.gt.f32.partialorder %v1012_v14, 0.0 }
 0x1d1   :  { %v1350_v13 = vpack.c.bf16 %v1299_v10, %v1298_v9  ;;  %v3285_v15 = vpop.f32.mrf.mxu1 }
 0x1d2   :  { %v1015_v17 = vadd.f32 %v3285_v15, %v3876_v37  ;;  %v1238_v19 = vmul.f32 0.01, %v1004_v11  ;;  %vm1174_vm5 = vcmp.gt.f32.partialorder %v1004_v11, 0.0  ;;  %v1304_v30 = vsel %vm1176_vm7, %v1012_v14, %v1240_v22  ;;  %v3478_v15 = vld [vmem:[%s4387_s2 + $0x20] sm:$0xff]  }
 0x1d3   :  { %v1006_v18 = vpop.f32.mrf.mxu1  ;;  %3346 = vmatprep.mubr.msk.bf16.mxu0 %vm760_vm6, %v1350_v13  ;;  %3388 = vmatprep.subr.bf16.mxu1 %v3478_v15 }
 0x1d4   :  { %vm1177_vm4 = vcmp.gt.f32.partialorder %v1015_v17, 0.0  ;;  %v1241_v20 = vmul.f32 0.01, %v1015_v17  ;;  %v1007_v21 = vadd.f32 %v3876_v37, %v1006_v18  ;;  %3347 = vmatmul.mubr.msk.bf16.gmra.mxu0 %vm760_vm6, %v1351_v16  ;;  %v1302_v27 = vsel %vm1174_vm5, %v1004_v11, %v1238_v19  ;;  %3389 = vmatpush3.bf16.msra.mxu1 %v3478_v15 }
 0x1d5   :  { %v3288_v23 = vpop.f32.mrf.mxu1 }
 0x1d6   :  { %vm1175_vm8 = vcmp.gt.f32.partialorder %v1007_v21, 0.0  ;;  %v1239_v24 = vmul.f32 0.01, %v1007_v21  ;;  %v1305_v25 = vsel %vm1177_vm4, %v1015_v17, %v1241_v20  ;;  %v1028_v32 = vadd.f32 %v3288_v23, %v3876_v37 }
 0x1d7   :  { %v1019_v26 = vpop.f32.mrf.mxu1  ;;  %v1353_v34 = vpack.c.bf16 %v1305_v25, %v1304_v30 }
 0x1d8   :  { %v1303_v28 = vsel %vm1175_vm8, %v1007_v21, %v1239_v24  ;;  %v1020_v29 = vadd.f32 %v3876_v37, %v1019_v26  ;;  %v1244_v41 = vmul.f32 0.01, %v1028_v32  ;;  %vm1180_vm11 = vcmp.gt.f32.partialorder %v1028_v32, 0.0 }
 0x1d9   :  { %v1352_v31 = vpack.c.bf16 %v1303_v28, %v1302_v27  ;;  %v3289_v33 = vpop.f32.mrf.mxu1 }
 0x1da   :  { %v1031_v35 = vadd.f32 %v3289_v33, %v3876_v37  ;;  %v1242_v38 = vmul.f32 0.01, %v1020_v29  ;;  %vm1178_vm10 = vcmp.gt.f32.partialorder %v1020_v29, 0.0  ;;  %v1308_v49 = vsel %vm1180_vm11, %v1028_v32, %v1244_v41 }
 0x1db   :  { %v1022_v36 = vpop.f32.mrf.mxu1  ;;  %3350 = vmatprep.mubr.msk.bf16.mxu0 %vm760_vm6, %v1352_v31 }
 0x1dc   :  { %vm1181_vm9 = vcmp.gt.f32.partialorder %v1031_v35, 0.0  ;;  %v1245_v39 = vmul.f32 0.01, %v1031_v35  ;;  %v1023_v40 = vadd.f32 %v3876_v37, %v1022_v36  ;;  %3351 = vmatmul.mubr.msk.bf16.gmra.mxu0 %vm760_vm6, %v1353_v34  ;;  %v1306_v46 = vsel %vm1178_vm10, %v1020_v29, %v1242_v38 }
 0x1dd   :  { %v3292_v42 = vpop.f32.mrf.mxu1 }
 0x1de   :  { %vm1179_vm12 = vcmp.gt.f32.partialorder %v1023_v40, 0.0  ;;  %v1243_v43 = vmul.f32 0.01, %v1023_v40  ;;  %v1309_v44 = vsel %vm1181_vm9, %v1031_v35, %v1245_v39  ;;  %v1044_v51 = vadd.f32 %v3292_v42, %v3876_v37 }
 0x1df   :  { %v1035_v45 = vpop.f32.mrf.mxu1  ;;  %v1355_v53 = vpack.c.bf16 %v1309_v44, %v1308_v49 }
 0x1e0   :  { %v1307_v47 = vsel %vm1179_vm12, %v1023_v40, %v1243_v43  ;;  %v1036_v48 = vadd.f32 %v3876_v37, %v1035_v45  ;;  %v1248_v59 = vmul.f32 0.01, %v1044_v51  ;;  %vm1184_vm15 = vcmp.gt.f32.partialorder %v1044_v51, 0.0 }
 0x1e1   :  { %v1354_v50 = vpack.c.bf16 %v1307_v47, %v1306_v46  ;;  %v3293_v52 = vpop.f32.mrf.mxu1 }
 0x1e2   :  { %v1047_v54 = vadd.f32 %v3293_v52, %v3876_v37  ;;  %v1246_v56 = vmul.f32 0.01, %v1036_v48  ;;  %vm1182_vm14 = vcmp.gt.f32.partialorder %v1036_v48, 0.0  ;;  %v1312_v3 = vsel %vm1184_vm15, %v1044_v51, %v1248_v59 }
 0x1e3   :  { %v1038_v55 = vpop.f32.mrf.mxu1  ;;  %3354 = vmatprep.mubr.msk.bf16.mxu0 %vm760_vm6, %v1354_v50 }
 0x1e4   :  { %vm1185_vm13 = vcmp.gt.f32.partialorder %v1047_v54, 0.0  ;;  %v1249_v57 = vmul.f32 0.01, %v1047_v54  ;;  %v1039_v58 = vadd.f32 %v3876_v37, %v1038_v55  ;;  %3355 = vmatmul.mubr.msk.bf16.gmra.mxu0 %vm760_vm6, %v1355_v53  ;;  %v1310_v0 = vsel %vm1182_vm14, %v1036_v48, %v1246_v56 }
 0x1e5   :  { %v3296_v60 = vpop.f32.mrf.mxu1 }
 0x1e6   :  { %vm1183_vm0 = vcmp.gt.f32.partialorder %v1039_v58, 0.0  ;;  %v1247_v61 = vmul.f32 0.01, %v1039_v58  ;;  %v1313_v62 = vsel %vm1185_vm13, %v1047_v54, %v1249_v57  ;;  %v1060_v5 = vadd.f32 %v3296_v60, %v3876_v37 }
 0x1e7   :  { %v1051_v63 = vpop.f32.mrf.mxu1  ;;  %v1357_v7 = vpack.c.bf16 %v1313_v62, %v1312_v3 }
 0x1e8   :  { %v1311_v1 = vsel %vm1183_vm0, %v1039_v58, %v1247_v61  ;;  %v1052_v2 = vadd.f32 %v3876_v37, %v1051_v63  ;;  %v1252_v13 = vmul.f32 0.01, %v1060_v5  ;;  %vm1188_vm3 = vcmp.gt.f32.partialorder %v1060_v5, 0.0 }
 0x1e9   :  { %v1356_v4 = vpack.c.bf16 %v1311_v1, %v1310_v0  ;;  %v3297_v6 = vpop.f32.mrf.mxu1 }
 0x1ea   :  { %v1063_v8 = vadd.f32 %v3297_v6, %v3876_v37  ;;  %v1250_v10 = vmul.f32 0.01, %v1052_v2  ;;  %vm1186_vm2 = vcmp.gt.f32.partialorder %v1052_v2, 0.0  ;;  %v1316_v22 = vsel %vm1188_vm3, %v1060_v5, %v1252_v13 }
 0x1eb   :  { %v1054_v9 = vpop.f32.mrf.mxu1  ;;  %3358 = vmatprep.mubr.msk.bf16.mxu0 %vm760_vm6, %v1356_v4 }
 0x1ec   :  { %vm1189_vm1 = vcmp.gt.f32.partialorder %v1063_v8, 0.0  ;;  %v1253_v11 = vmul.f32 0.01, %v1063_v8  ;;  %v1055_v12 = vadd.f32 %v3876_v37, %v1054_v9  ;;  %3359 = vmatmul.mubr.msk.bf16.gmra.mxu0 %vm760_vm6, %v1357_v7  ;;  %v1314_v19 = vsel %vm1186_vm2, %v1052_v2, %v1250_v10 }
 0x1ed   :  { %v3300_v14 = vpop.f32.mrf.mxu1 }
 0x1ee   :  { %vm1187_vm4 = vcmp.gt.f32.partialorder %v1055_v12, 0.0  ;;  %v1251_v16 = vmul.f32 0.01, %v1055_v12  ;;  %v1317_v17 = vsel %vm1189_vm1, %v1063_v8, %v1253_v11  ;;  %v1076_v24 = vadd.f32 %v3300_v14, %v3876_v37 }
 0x1ef   :  { %v1067_v18 = vpop.f32.mrf.mxu1  ;;  %v1359_v26 = vpack.c.bf16 %v1317_v17, %v1316_v22 }
 0x1f0   :  { %v1315_v20 = vsel %vm1187_vm4, %v1055_v12, %v1251_v16  ;;  %v1068_v21 = vadd.f32 %v3876_v37, %v1067_v18  ;;  %v1256_v32 = vmul.f32 0.01, %v1076_v24  ;;  %vm1192_vm8 = vcmp.gt.f32.partialorder %v1076_v24, 0.0 }
 0x1f1   :  { %v1358_v23 = vpack.c.bf16 %v1315_v20, %v1314_v19  ;;  %v3301_v25 = vpop.f32.mrf.mxu1 }
 0x1f2   :  { %v1079_v27 = vadd.f32 %v3301_v25, %v3876_v37  ;;  %v1254_v29 = vmul.f32 0.01, %v1068_v21  ;;  %vm1190_vm7 = vcmp.gt.f32.partialorder %v1068_v21, 0.0  ;;  %v1320_v41 = vsel %vm1192_vm8, %v1076_v24, %v1256_v32 }
 0x1f3   :  { %v1070_v28 = vpop.f32.mrf.mxu1  ;;  %3362 = vmatprep.mubr.msk.bf16.mxu0 %vm760_vm6, %v1358_v23 }
 0x1f4   :  { %vm1193_vm5 = vcmp.gt.f32.partialorder %v1079_v27, 0.0  ;;  %v1257_v30 = vmul.f32 0.01, %v1079_v27  ;;  %v1071_v31 = vadd.f32 %v3876_v37, %v1070_v28  ;;  %3363 = vmatmul.mubr.msk.bf16.gmra.mxu0 %vm760_vm6, %v1359_v26  ;;  %v1318_v38 = vsel %vm1190_vm7, %v1068_v21, %v1254_v29 }
 0x1f5   :  { %v3304_v33 = vpop.f32.mrf.mxu1 }
 0x1f6   :  { %vm1191_vm9 = vcmp.gt.f32.partialorder %v1071_v31, 0.0  ;;  %v1255_v34 = vmul.f32 0.01, %v1071_v31  ;;  %v1321_v35 = vsel %vm1193_vm5, %v1079_v27, %v1257_v30  ;;  %v1092_v43 = vadd.f32 %v3304_v33, %v3876_v37 }
 0x1f7   :  { %v1083_v36 = vpop.f32.mrf.mxu1  ;;  %v1361_v45 = vpack.c.bf16 %v1321_v35, %v1320_v41 }
 0x1f8   :  { %v1319_v39 = vsel %vm1191_vm9, %v1071_v31, %v1255_v34  ;;  %v1084_v40 = vadd.f32 %v3876_v37, %v1083_v36  ;;  %v1260_v51 = vmul.f32 0.01, %v1092_v43  ;;  %vm1196_vm12 = vcmp.gt.f32.partialorder %v1092_v43, 0.0 }
 0x1f9   :  { %v1360_v42 = vpack.c.bf16 %v1319_v39, %v1318_v38  ;;  %v3305_v44 = vpop.f32.mrf.mxu1 }
 0x1fa   :  { %v1095_v46 = vadd.f32 %v3305_v44, %v3876_v37  ;;  %v1258_v48 = vmul.f32 0.01, %v1084_v40  ;;  %vm1194_vm11 = vcmp.gt.f32.partialorder %v1084_v40, 0.0  ;;  %v1324_v59 = vsel %vm1196_vm12, %v1092_v43, %v1260_v51 }
 0x1fb   :  { %v1086_v47 = vpop.f32.mrf.mxu1  ;;  %3366 = vmatprep.mubr.msk.bf16.mxu0 %vm760_vm6, %v1360_v42 }
 0x1fc   :  { %vm1197_vm10 = vcmp.gt.f32.partialorder %v1095_v46, 0.0  ;;  %v1261_v49 = vmul.f32 0.01, %v1095_v46  ;;  %v1087_v50 = vadd.f32 %v3876_v37, %v1086_v47  ;;  %3367 = vmatmul.mubr.msk.bf16.gmra.mxu0 %vm760_vm6, %v1361_v45  ;;  %v1322_v56 = vsel %vm1194_vm11, %v1084_v40, %v1258_v48 }
 0x1fd   :  { %v3308_v52 = vpop.f32.mrf.mxu1 }
 0x1fe   :  { %vm1195_vm13 = vcmp.gt.f32.partialorder %v1087_v50, 0.0  ;;  %v1259_v53 = vmul.f32 0.01, %v1087_v50  ;;  %v1325_v54 = vsel %vm1197_vm10, %v1095_v46, %v1261_v49  ;;  %v1108_v61 = vadd.f32 %v3308_v52, %v3876_v37 }
 0x1ff   :  { %v1099_v55 = vpop.f32.mrf.mxu1  ;;  %v1363_v63 = vpack.c.bf16 %v1325_v54, %v1324_v59 }
 0x200   :  { %v1323_v57 = vsel %vm1195_vm13, %v1087_v50, %v1259_v53  ;;  %v1100_v58 = vadd.f32 %v3876_v37, %v1099_v55  ;;  %v1264_v5 = vmul.f32 0.01, %v1108_v61  ;;  %vm1200_vm0 = vcmp.gt.f32.partialorder %v1108_v61, 0.0 }
 0x201   :  { %v1362_v60 = vpack.c.bf16 %v1323_v57, %v1322_v56  ;;  %v3309_v62 = vpop.f32.mrf.mxu1 }
 0x202   :  { %v1111_v0 = vadd.f32 %v3309_v62, %v3876_v37  ;;  %v1262_v2 = vmul.f32 0.01, %v1100_v58  ;;  %vm1198_vm15 = vcmp.gt.f32.partialorder %v1100_v58, 0.0  ;;  %v1328_v13 = vsel %vm1200_vm0, %v1108_v61, %v1264_v5 }
 0x203   :  { %v1102_v1 = vpop.f32.mrf.mxu1  ;;  %3370 = vmatprep.mubr.msk.bf16.mxu0 %vm760_vm6, %v1362_v60 }
 0x204   :  { %vm1201_vm14 = vcmp.gt.f32.partialorder %v1111_v0, 0.0  ;;  %v1265_v3 = vmul.f32 0.01, %v1111_v0  ;;  %v1103_v4 = vadd.f32 %v3876_v37, %v1102_v1  ;;  %3371 = vmatmul.mubr.msk.bf16.gmra.mxu0 %vm760_vm6, %v1363_v63  ;;  %v1326_v10 = vsel %vm1198_vm15, %v1100_v58, %v1262_v2 }
 0x205   :  { %v3312_v6 = vpop.f32.mrf.mxu1 }
 0x206   :  { %vm1199_vm1 = vcmp.gt.f32.partialorder %v1103_v4, 0.0  ;;  %v1263_v7 = vmul.f32 0.01, %v1103_v4  ;;  %v1329_v8 = vsel %vm1201_vm14, %v1111_v0, %v1265_v3  ;;  %v1124_v15 = vadd.f32 %v3312_v6, %v3876_v37 }
 0x207   :  { %v1115_v9 = vpop.f32.mrf.mxu1  ;;  %v1365_v17 = vpack.c.bf16 %v1329_v8, %v1328_v13 }
 0x208   :  { %v1327_v11 = vsel %vm1199_vm1, %v1103_v4, %v1263_v7  ;;  %v1116_v12 = vadd.f32 %v3876_v37, %v1115_v9  ;;  %v1268_v23 = vmul.f32 0.01, %v1124_v15  ;;  %vm1204_vm4 = vcmp.gt.f32.partialorder %v1124_v15, 0.0 }
 0x209   :  { %v1364_v14 = vpack.c.bf16 %v1327_v11, %v1326_v10  ;;  %v3313_v16 = vpop.f32.mrf.mxu1 }
 0x20a   :  { %v1127_v18 = vadd.f32 %v3313_v16, %v3876_v37  ;;  %v1266_v20 = vmul.f32 0.01, %v1116_v12  ;;  %vm1202_vm3 = vcmp.gt.f32.partialorder %v1116_v12, 0.0  ;;  %v1332_v31 = vsel %vm1204_vm4, %v1124_v15, %v1268_v23 }
 0x20b   :  { %v1118_v19 = vpop.f32.mrf.mxu1  ;;  %3374 = vmatprep.mubr.msk.bf16.mxu0 %vm760_vm6, %v1364_v14 }
 0x20c   :  { %vm1205_vm2 = vcmp.gt.f32.partialorder %v1127_v18, 0.0  ;;  %v1269_v21 = vmul.f32 0.01, %v1127_v18  ;;  %v1119_v22 = vadd.f32 %v3876_v37, %v1118_v19  ;;  %3375 = vmatmul.mubr.msk.bf16.gmra.mxu0 %vm760_vm6, %v1365_v17  ;;  %v1330_v28 = vsel %vm1202_vm3, %v1116_v12, %v1266_v20 }
 0x20d   :  { %v3316_v24 = vpop.f32.mrf.mxu1 }
 0x20e   :  { %vm1203_vm5 = vcmp.gt.f32.partialorder %v1119_v22, 0.0  ;;  %v1267_v25 = vmul.f32 0.01, %v1119_v22  ;;  %v1333_v26 = vsel %vm1205_vm2, %v1127_v18, %v1269_v21  ;;  %v1140_v33 = vadd.f32 %v3316_v24, %v3876_v37 }
 0x20f   :  { %v1131_v27 = vpop.f32.mrf.mxu1  ;;  %v1367_v35 = vpack.c.bf16 %v1333_v26, %v1332_v31 }
 0x210   :  { %v1331_v29 = vsel %vm1203_vm5, %v1119_v22, %v1267_v25  ;;  %v1132_v30 = vadd.f32 %v3876_v37, %v1131_v27  ;;  %v1272_v42 = vmul.f32 0.01, %v1140_v33  ;;  %vm1208_vm9 = vcmp.gt.f32.partialorder %v1140_v33, 0.0 }
 0x211   :  { %v1366_v32 = vpack.c.bf16 %v1331_v29, %v1330_v28  ;;  %v3317_v34 = vpop.f32.mrf.mxu1 }
 0x212   :  { %v1143_v36 = vadd.f32 %v3317_v34, %v3876_v37  ;;  %v1270_v39 = vmul.f32 0.01, %v1132_v30  ;;  %vm1206_vm8 = vcmp.gt.f32.partialorder %v1132_v30, 0.0  ;;  %v1336_v47 = vsel %vm1208_vm9, %v1140_v33, %v1272_v42 }
 0x213   :  { %v1134_v38 = vpop.f32.mrf.mxu1  ;;  %3378 = vmatprep.mubr.msk.bf16.mxu0 %vm760_vm6, %v1366_v32 }
 0x214   :  { %vm1209_vm7 = vcmp.gt.f32.partialorder %v1143_v36, 0.0  ;;  %v1273_v40 = vmul.f32 0.01, %v1143_v36  ;;  %v1135_v41 = vadd.f32 %v3876_v37, %v1134_v38  ;;  %3379 = vmatmul.mubr.msk.bf16.gmra.mxu0 %vm760_vm6, %v1367_v35  ;;  %v1334_v45 = vsel %vm1206_vm8, %v1132_v30, %v1270_v39  ;;  %v3983_v37 = vld [vmem:[%s4388_s3 + $0x2] ss:$0 sm:$0xff] }
 0x216   :  { %vm1207_vm10 = vcmp.gt.f32.partialorder %v1135_v41, 0.0  ;;  %v1271_v43 = vmul.f32 0.01, %v1135_v41  ;;  %v1337_v44 = vsel %vm1209_vm7, %v1143_v36, %v1273_v40 }
 0x217   :  { %v1369_v49 = vpack.c.bf16 %v1337_v44, %v1336_v47 }
 0x218   :  { %v1335_v46 = vsel %vm1207_vm10, %v1135_v41, %v1271_v43 }
 0x219   :  { %v1368_v48 = vpack.c.bf16 %v1335_v46, %v1334_v45 }
 0x21b   :  { %3382 = vmatprep.mubr.msk.bf16.mxu0 %vm760_vm6, %v1368_v48 }
 0x21c   :  { %3383 = vmatmul.mubr.msk.bf16.gmra.mxu0 %vm760_vm6, %v1369_v49 }
 0x264   :  { %v3324_v50 = vpop.f32.mrf.mxu0 }
 0x265   :  { %v1531_v53 = vadd.f32 %v3324_v50, %v3983_v37 }
 0x266   :  { %v1522_v51 = vpop.f32.mrf.mxu0 }
 0x267   :  { %v1523_v52 = vadd.f32 %v3983_v37, %v1522_v51  ;;  %v1843_v60 = vmul.f32 0.01, %v1531_v53  ;;  %vm1779_vm13 = vcmp.gt.f32.partialorder %v1531_v53, 0.0 }
 0x268   :  { %v3325_v54 = vpop.f32.mrf.mxu0 }
 0x269   :  { %v1534_v55 = vadd.f32 %v3325_v54, %v3983_v37  ;;  %v1841_v57 = vmul.f32 0.01, %v1523_v52  ;;  %vm1777_vm12 = vcmp.gt.f32.partialorder %v1523_v52, 0.0  ;;  %v1907_v4 = vsel %vm1779_vm13, %v1531_v53, %v1843_v60 }
 0x26a   :  { %v1525_v56 = vpop.f32.mrf.mxu0 }
 0x26b   :  { %vm1780_vm11 = vcmp.gt.f32.partialorder %v1534_v55, 0.0  ;;  %v1844_v58 = vmul.f32 0.01, %v1534_v55  ;;  %v1526_v59 = vadd.f32 %v3983_v37, %v1525_v56  ;;  %v1905_v1 = vsel %vm1777_vm12, %v1523_v52, %v1841_v57 }
 0x26c   :  { %v3328_v61 = vpop.f32.mrf.mxu0 }
 0x26d   :  { %vm1778_vm14 = vcmp.gt.f32.partialorder %v1526_v59, 0.0  ;;  %v1842_v62 = vmul.f32 0.01, %v1526_v59  ;;  %v1908_v63 = vsel %vm1780_vm11, %v1534_v55, %v1844_v58  ;;  %v1547_v6 = vadd.f32 %v3328_v61, %v3983_v37 }
 0x26e   :  { %v1538_v0 = vpop.f32.mrf.mxu0  ;;  %v1970_v8 = vpack.c.bf16 %v1908_v63, %v1907_v4 }
 0x26f   :  { %v1906_v2 = vsel %vm1778_vm14, %v1526_v59, %v1842_v62  ;;  %v1539_v3 = vadd.f32 %v3983_v37, %v1538_v0  ;;  %v1847_v14 = vmul.f32 0.01, %v1547_v6  ;;  %vm1783_vm1 = vcmp.gt.f32.partialorder %v1547_v6, 0.0 }
 0x270   :  { %v1969_v5 = vpack.c.bf16 %v1906_v2, %v1905_v1  ;;  %v3329_v7 = vpop.f32.mrf.mxu0 }
 0x271   :  { %v1550_v9 = vadd.f32 %v3329_v7, %v3983_v37  ;;  %v1845_v11 = vmul.f32 0.01, %v1539_v3  ;;  %vm1781_vm0 = vcmp.gt.f32.partialorder %v1539_v3, 0.0  ;;  %v1911_v22 = vsel %vm1783_vm1, %v1547_v6, %v1847_v14 }
 0x272   :  { %v1541_v10 = vpop.f32.mrf.mxu0  ;;  %3390 = vmatprep.mubr.msk.bf16.mxu1 %vm760_vm6, %v1969_v5 }
 0x273   :  { %vm1784_vm15 = vcmp.gt.f32.partialorder %v1550_v9, 0.0  ;;  %v1848_v12 = vmul.f32 0.01, %v1550_v9  ;;  %v1542_v13 = vadd.f32 %v3983_v37, %v1541_v10  ;;  %3391 = vmatmul.mubr.msk.bf16.vlgmr.msra.gmra.mxu1 %vm760_vm6, %v1970_v8  ;;  %v1909_v19 = vsel %vm1781_vm0, %v1539_v3, %v1845_v11 }
 0x274   :  { %v3332_v15 = vpop.f32.mrf.mxu0 }
 0x275   :  { %vm1782_vm2 = vcmp.gt.f32.partialorder %v1542_v13, 0.0  ;;  %v1846_v16 = vmul.f32 0.01, %v1542_v13  ;;  %v1912_v17 = vsel %vm1784_vm15, %v1550_v9, %v1848_v12  ;;  %v1563_v24 = vadd.f32 %v3332_v15, %v3983_v37 }
 0x276   :  { %v1554_v18 = vpop.f32.mrf.mxu0  ;;  %v1972_v26 = vpack.c.bf16 %v1912_v17, %v1911_v22 }
 0x277   :  { %v1910_v20 = vsel %vm1782_vm2, %v1542_v13, %v1846_v16  ;;  %v1555_v21 = vadd.f32 %v3983_v37, %v1554_v18  ;;  %v1851_v32 = vmul.f32 0.01, %v1563_v24  ;;  %vm1787_vm5 = vcmp.gt.f32.partialorder %v1563_v24, 0.0 }
 0x278   :  { %v1971_v23 = vpack.c.bf16 %v1910_v20, %v1909_v19  ;;  %v3333_v25 = vpop.f32.mrf.mxu0 }
 0x279   :  { %v1566_v27 = vadd.f32 %v3333_v25, %v3983_v37  ;;  %v1849_v29 = vmul.f32 0.01, %v1555_v21  ;;  %vm1785_vm4 = vcmp.gt.f32.partialorder %v1555_v21, 0.0  ;;  %v1915_v41 = vsel %vm1787_vm5, %v1563_v24, %v1851_v32 }
 0x27a   :  { %v1557_v28 = vpop.f32.mrf.mxu0  ;;  %3394 = vmatprep.mubr.msk.bf16.mxu1 %vm760_vm6, %v1971_v23 }
 0x27b   :  { %vm1788_vm3 = vcmp.gt.f32.partialorder %v1566_v27, 0.0  ;;  %v1852_v30 = vmul.f32 0.01, %v1566_v27  ;;  %v1558_v31 = vadd.f32 %v3983_v37, %v1557_v28  ;;  %3395 = vmatmul.mubr.msk.bf16.gmra.mxu1 %vm760_vm6, %v1972_v26  ;;  %v1913_v38 = vsel %vm1785_vm4, %v1555_v21, %v1849_v29 }
 0x27c   :  { %v3336_v33 = vpop.f32.mrf.mxu0 }
 0x27d   :  { %vm1786_vm7 = vcmp.gt.f32.partialorder %v1558_v31, 0.0  ;;  %v1850_v34 = vmul.f32 0.01, %v1558_v31  ;;  %v1916_v35 = vsel %vm1788_vm3, %v1566_v27, %v1852_v30  ;;  %v1579_v43 = vadd.f32 %v3336_v33, %v3983_v37 }
 0x27e   :  { %v1570_v36 = vpop.f32.mrf.mxu0  ;;  %v1974_v45 = vpack.c.bf16 %v1916_v35, %v1915_v41 }
 0x27f   :  { %v1914_v39 = vsel %vm1786_vm7, %v1558_v31, %v1850_v34  ;;  %v1571_v40 = vadd.f32 %v3983_v37, %v1570_v36  ;;  %v1855_v51 = vmul.f32 0.01, %v1579_v43  ;;  %vm1791_vm10 = vcmp.gt.f32.partialorder %v1579_v43, 0.0 }
 0x280   :  { %v1973_v42 = vpack.c.bf16 %v1914_v39, %v1913_v38  ;;  %v3337_v44 = vpop.f32.mrf.mxu0 }
 0x281   :  { %v1582_v46 = vadd.f32 %v3337_v44, %v3983_v37  ;;  %v1853_v48 = vmul.f32 0.01, %v1571_v40  ;;  %vm1789_vm9 = vcmp.gt.f32.partialorder %v1571_v40, 0.0  ;;  %v1919_v59 = vsel %vm1791_vm10, %v1579_v43, %v1855_v51 }
 0x282   :  { %v1573_v47 = vpop.f32.mrf.mxu0  ;;  %3398 = vmatprep.mubr.msk.bf16.mxu1 %vm760_vm6, %v1973_v42 }
 0x283   :  { %vm1792_vm8 = vcmp.gt.f32.partialorder %v1582_v46, 0.0  ;;  %v1856_v49 = vmul.f32 0.01, %v1582_v46  ;;  %v1574_v50 = vadd.f32 %v3983_v37, %v1573_v47  ;;  %3399 = vmatmul.mubr.msk.bf16.gmra.mxu1 %vm760_vm6, %v1974_v45  ;;  %v1917_v56 = vsel %vm1789_vm9, %v1571_v40, %v1853_v48 }
 0x284   :  { %v3340_v52 = vpop.f32.mrf.mxu0 }
 0x285   :  { %vm1790_vm11 = vcmp.gt.f32.partialorder %v1574_v50, 0.0  ;;  %v1854_v53 = vmul.f32 0.01, %v1574_v50  ;;  %v1920_v54 = vsel %vm1792_vm8, %v1582_v46, %v1856_v49  ;;  %v1595_v61 = vadd.f32 %v3340_v52, %v3983_v37 }
 0x286   :  { %v1586_v55 = vpop.f32.mrf.mxu0  ;;  %v1976_v63 = vpack.c.bf16 %v1920_v54, %v1919_v59 }
 0x287   :  { %v1918_v57 = vsel %vm1790_vm11, %v1574_v50, %v1854_v53  ;;  %v1587_v58 = vadd.f32 %v3983_v37, %v1586_v55  ;;  %v1859_v5 = vmul.f32 0.01, %v1595_v61  ;;  %vm1795_vm14 = vcmp.gt.f32.partialorder %v1595_v61, 0.0 }
 0x288   :  { %v1975_v60 = vpack.c.bf16 %v1918_v57, %v1917_v56  ;;  %v3341_v62 = vpop.f32.mrf.mxu0 }
 0x289   :  { %v1598_v0 = vadd.f32 %v3341_v62, %v3983_v37  ;;  %v1857_v2 = vmul.f32 0.01, %v1587_v58  ;;  %vm1793_vm13 = vcmp.gt.f32.partialorder %v1587_v58, 0.0  ;;  %v1923_v13 = vsel %vm1795_vm14, %v1595_v61, %v1859_v5 }
 0x28a   :  { %v1589_v1 = vpop.f32.mrf.mxu0  ;;  %3402 = vmatprep.mubr.msk.bf16.mxu1 %vm760_vm6, %v1975_v60 }
 0x28b   :  { %vm1796_vm12 = vcmp.gt.f32.partialorder %v1598_v0, 0.0  ;;  %v1860_v3 = vmul.f32 0.01, %v1598_v0  ;;  %v1590_v4 = vadd.f32 %v3983_v37, %v1589_v1  ;;  %3403 = vmatmul.mubr.msk.bf16.gmra.mxu1 %vm760_vm6, %v1976_v63  ;;  %v1921_v10 = vsel %vm1793_vm13, %v1587_v58, %v1857_v2 }
 0x28c   :  { %v3344_v6 = vpop.f32.mrf.mxu0 }
 0x28d   :  { %vm1794_vm15 = vcmp.gt.f32.partialorder %v1590_v4, 0.0  ;;  %v1858_v7 = vmul.f32 0.01, %v1590_v4  ;;  %v1924_v8 = vsel %vm1796_vm12, %v1598_v0, %v1860_v3  ;;  %v1611_v15 = vadd.f32 %v3344_v6, %v3983_v37 }
 0x28e   :  { %v1602_v9 = vpop.f32.mrf.mxu0  ;;  %v1978_v17 = vpack.c.bf16 %v1924_v8, %v1923_v13 }
 0x28f   :  { %v1922_v11 = vsel %vm1794_vm15, %v1590_v4, %v1858_v7  ;;  %v1603_v12 = vadd.f32 %v3983_v37, %v1602_v9  ;;  %v1863_v23 = vmul.f32 0.01, %v1611_v15  ;;  %vm1799_vm2 = vcmp.gt.f32.partialorder %v1611_v15, 0.0 }
 0x290   :  { %v1977_v14 = vpack.c.bf16 %v1922_v11, %v1921_v10  ;;  %v3345_v16 = vpop.f32.mrf.mxu0 }
 0x291   :  { %v1614_v18 = vadd.f32 %v3345_v16, %v3983_v37  ;;  %v1861_v20 = vmul.f32 0.01, %v1603_v12  ;;  %vm1797_vm1 = vcmp.gt.f32.partialorder %v1603_v12, 0.0  ;;  %v1927_v31 = vsel %vm1799_vm2, %v1611_v15, %v1863_v23 }
 0x292   :  { %v1605_v19 = vpop.f32.mrf.mxu0  ;;  %3406 = vmatprep.mubr.msk.bf16.mxu1 %vm760_vm6, %v1977_v14 }
 0x293   :  { %vm1800_vm0 = vcmp.gt.f32.partialorder %v1614_v18, 0.0  ;;  %v1864_v21 = vmul.f32 0.01, %v1614_v18  ;;  %v1606_v22 = vadd.f32 %v3983_v37, %v1605_v19  ;;  %3407 = vmatmul.mubr.msk.bf16.gmra.mxu1 %vm760_vm6, %v1978_v17  ;;  %v1925_v28 = vsel %vm1797_vm1, %v1603_v12, %v1861_v20 }
 0x294   :  { %v3348_v24 = vpop.f32.mrf.mxu0 }
 0x295   :  { %vm1798_vm3 = vcmp.gt.f32.partialorder %v1606_v22, 0.0  ;;  %v1862_v25 = vmul.f32 0.01, %v1606_v22  ;;  %v1928_v26 = vsel %vm1800_vm0, %v1614_v18, %v1864_v21  ;;  %v1627_v33 = vadd.f32 %v3348_v24, %v3983_v37 }
 0x296   :  { %v1618_v27 = vpop.f32.mrf.mxu0  ;;  %v1980_v35 = vpack.c.bf16 %v1928_v26, %v1927_v31 }
 0x297   :  { %v1926_v29 = vsel %vm1798_vm3, %v1606_v22, %v1862_v25  ;;  %v1619_v30 = vadd.f32 %v3983_v37, %v1618_v27  ;;  %v1867_v42 = vmul.f32 0.01, %v1627_v33  ;;  %vm1803_vm7 = vcmp.gt.f32.partialorder %v1627_v33, 0.0 }
 0x298   :  { %v1979_v32 = vpack.c.bf16 %v1926_v29, %v1925_v28  ;;  %v3349_v34 = vpop.f32.mrf.mxu0 }
 0x299   :  { %v1630_v36 = vadd.f32 %v3349_v34, %v3983_v37  ;;  %v1865_v39 = vmul.f32 0.01, %v1619_v30  ;;  %vm1801_vm5 = vcmp.gt.f32.partialorder %v1619_v30, 0.0  ;;  %v1931_v50 = vsel %vm1803_vm7, %v1627_v33, %v1867_v42 }
 0x29a   :  { %v1621_v38 = vpop.f32.mrf.mxu0  ;;  %3410 = vmatprep.mubr.msk.bf16.mxu1 %vm760_vm6, %v1979_v32 }
 0x29b   :  { %vm1804_vm4 = vcmp.gt.f32.partialorder %v1630_v36, 0.0  ;;  %v1868_v40 = vmul.f32 0.01, %v1630_v36  ;;  %v1622_v41 = vadd.f32 %v3983_v37, %v1621_v38  ;;  %3411 = vmatmul.mubr.msk.bf16.gmra.mxu1 %vm760_vm6, %v1980_v35  ;;  %v1929_v47 = vsel %vm1801_vm5, %v1619_v30, %v1865_v39 }
 0x29c   :  { %v3352_v43 = vpop.f32.mrf.mxu0 }
 0x29d   :  { %vm1802_vm8 = vcmp.gt.f32.partialorder %v1622_v41, 0.0  ;;  %v1866_v44 = vmul.f32 0.01, %v1622_v41  ;;  %v1932_v45 = vsel %vm1804_vm4, %v1630_v36, %v1868_v40  ;;  %v1643_v52 = vadd.f32 %v3352_v43, %v3983_v37 }
 0x29e   :  { %v1634_v46 = vpop.f32.mrf.mxu0  ;;  %v1982_v54 = vpack.c.bf16 %v1932_v45, %v1931_v50 }
 0x29f   :  { %v1930_v48 = vsel %vm1802_vm8, %v1622_v41, %v1866_v44  ;;  %v1635_v49 = vadd.f32 %v3983_v37, %v1634_v46  ;;  %v1871_v60 = vmul.f32 0.01, %v1643_v52  ;;  %vm1807_vm11 = vcmp.gt.f32.partialorder %v1643_v52, 0.0 }
 0x2a0   :  { %v1981_v51 = vpack.c.bf16 %v1930_v48, %v1929_v47  ;;  %v3353_v53 = vpop.f32.mrf.mxu0 }
 0x2a1   :  { %v1646_v55 = vadd.f32 %v3353_v53, %v3983_v37  ;;  %v1869_v57 = vmul.f32 0.01, %v1635_v49  ;;  %vm1805_vm10 = vcmp.gt.f32.partialorder %v1635_v49, 0.0  ;;  %v1935_v4 = vsel %vm1807_vm11, %v1643_v52, %v1871_v60 }
 0x2a2   :  { %v1637_v56 = vpop.f32.mrf.mxu0  ;;  %3414 = vmatprep.mubr.msk.bf16.mxu1 %vm760_vm6, %v1981_v51 }
 0x2a3   :  { %vm1808_vm9 = vcmp.gt.f32.partialorder %v1646_v55, 0.0  ;;  %v1872_v58 = vmul.f32 0.01, %v1646_v55  ;;  %v1638_v59 = vadd.f32 %v3983_v37, %v1637_v56  ;;  %3415 = vmatmul.mubr.msk.bf16.gmra.mxu1 %vm760_vm6, %v1982_v54  ;;  %v1933_v1 = vsel %vm1805_vm10, %v1635_v49, %v1869_v57 }
 0x2a4   :  { %v3356_v61 = vpop.f32.mrf.mxu0 }
 0x2a5   :  { %vm1806_vm12 = vcmp.gt.f32.partialorder %v1638_v59, 0.0  ;;  %v1870_v62 = vmul.f32 0.01, %v1638_v59  ;;  %v1936_v63 = vsel %vm1808_vm9, %v1646_v55, %v1872_v58  ;;  %v1659_v6 = vadd.f32 %v3356_v61, %v3983_v37 }
 0x2a6   :  { %v1650_v0 = vpop.f32.mrf.mxu0  ;;  %v1984_v8 = vpack.c.bf16 %v1936_v63, %v1935_v4 }
 0x2a7   :  { %v1934_v2 = vsel %vm1806_vm12, %v1638_v59, %v1870_v62  ;;  %v1651_v3 = vadd.f32 %v3983_v37, %v1650_v0  ;;  %v1875_v14 = vmul.f32 0.01, %v1659_v6  ;;  %vm1811_vm15 = vcmp.gt.f32.partialorder %v1659_v6, 0.0 }
 0x2a8   :  { %v1983_v5 = vpack.c.bf16 %v1934_v2, %v1933_v1  ;;  %v3357_v7 = vpop.f32.mrf.mxu0 }
 0x2a9   :  { %v1662_v9 = vadd.f32 %v3357_v7, %v3983_v37  ;;  %v1873_v11 = vmul.f32 0.01, %v1651_v3  ;;  %vm1809_vm14 = vcmp.gt.f32.partialorder %v1651_v3, 0.0  ;;  %v1939_v22 = vsel %vm1811_vm15, %v1659_v6, %v1875_v14 }
 0x2aa   :  { %v1653_v10 = vpop.f32.mrf.mxu0  ;;  %3418 = vmatprep.mubr.msk.bf16.mxu1 %vm760_vm6, %v1983_v5 }
 0x2ab   :  { %vm1812_vm13 = vcmp.gt.f32.partialorder %v1662_v9, 0.0  ;;  %v1876_v12 = vmul.f32 0.01, %v1662_v9  ;;  %v1654_v13 = vadd.f32 %v3983_v37, %v1653_v10  ;;  %3419 = vmatmul.mubr.msk.bf16.gmra.mxu1 %vm760_vm6, %v1984_v8  ;;  %v1937_v19 = vsel %vm1809_vm14, %v1651_v3, %v1873_v11 }
 0x2ac   :  { %v3360_v15 = vpop.f32.mrf.mxu0 }
 0x2ad   :  { %vm1810_vm0 = vcmp.gt.f32.partialorder %v1654_v13, 0.0  ;;  %v1874_v16 = vmul.f32 0.01, %v1654_v13  ;;  %v1940_v17 = vsel %vm1812_vm13, %v1662_v9, %v1876_v12  ;;  %v1675_v24 = vadd.f32 %v3360_v15, %v3983_v37 }
 0x2ae   :  { %v1666_v18 = vpop.f32.mrf.mxu0  ;;  %v1986_v26 = vpack.c.bf16 %v1940_v17, %v1939_v22 }
 0x2af   :  { %v1938_v20 = vsel %vm1810_vm0, %v1654_v13, %v1874_v16  ;;  %v1667_v21 = vadd.f32 %v3983_v37, %v1666_v18  ;;  %v1879_v32 = vmul.f32 0.01, %v1675_v24  ;;  %vm1815_vm3 = vcmp.gt.f32.partialorder %v1675_v24, 0.0 }
 0x2b0   :  { %v1985_v23 = vpack.c.bf16 %v1938_v20, %v1937_v19  ;;  %v3361_v25 = vpop.f32.mrf.mxu0 }
 0x2b1   :  { %v1678_v27 = vadd.f32 %v3361_v25, %v3983_v37  ;;  %v1877_v29 = vmul.f32 0.01, %v1667_v21  ;;  %vm1813_vm2 = vcmp.gt.f32.partialorder %v1667_v21, 0.0  ;;  %v1943_v41 = vsel %vm1815_vm3, %v1675_v24, %v1879_v32 }
 0x2b2   :  { %v1669_v28 = vpop.f32.mrf.mxu0  ;;  %3422 = vmatprep.mubr.msk.bf16.mxu1 %vm760_vm6, %v1985_v23 }
 0x2b3   :  { %vm1816_vm1 = vcmp.gt.f32.partialorder %v1678_v27, 0.0  ;;  %v1880_v30 = vmul.f32 0.01, %v1678_v27  ;;  %v1670_v31 = vadd.f32 %v3983_v37, %v1669_v28  ;;  %3423 = vmatmul.mubr.msk.bf16.gmra.mxu1 %vm760_vm6, %v1986_v26  ;;  %v1941_v38 = vsel %vm1813_vm2, %v1667_v21, %v1877_v29 }
 0x2b4   :  { %v3364_v33 = vpop.f32.mrf.mxu0 }
 0x2b5   :  { %vm1814_vm4 = vcmp.gt.f32.partialorder %v1670_v31, 0.0  ;;  %v1878_v34 = vmul.f32 0.01, %v1670_v31  ;;  %v1944_v35 = vsel %vm1816_vm1, %v1678_v27, %v1880_v30  ;;  %v1691_v43 = vadd.f32 %v3364_v33, %v3983_v37 }
 0x2b6   :  { %v1682_v36 = vpop.f32.mrf.mxu0  ;;  %v1988_v45 = vpack.c.bf16 %v1944_v35, %v1943_v41 }
 0x2b7   :  { %v1942_v39 = vsel %vm1814_vm4, %v1670_v31, %v1878_v34  ;;  %v1683_v40 = vadd.f32 %v3983_v37, %v1682_v36  ;;  %v1883_v51 = vmul.f32 0.01, %v1691_v43  ;;  %vm1819_vm8 = vcmp.gt.f32.partialorder %v1691_v43, 0.0 }
 0x2b8   :  { %v1987_v42 = vpack.c.bf16 %v1942_v39, %v1941_v38  ;;  %v3365_v44 = vpop.f32.mrf.mxu0 }
 0x2b9   :  { %v1694_v46 = vadd.f32 %v3365_v44, %v3983_v37  ;;  %v1881_v48 = vmul.f32 0.01, %v1683_v40  ;;  %vm1817_vm7 = vcmp.gt.f32.partialorder %v1683_v40, 0.0  ;;  %v1947_v59 = vsel %vm1819_vm8, %v1691_v43, %v1883_v51 }
 0x2ba   :  { %v1685_v47 = vpop.f32.mrf.mxu0  ;;  %3426 = vmatprep.mubr.msk.bf16.mxu1 %vm760_vm6, %v1987_v42 }
 0x2bb   :  { %vm1820_vm5 = vcmp.gt.f32.partialorder %v1694_v46, 0.0  ;;  %v1884_v49 = vmul.f32 0.01, %v1694_v46  ;;  %v1686_v50 = vadd.f32 %v3983_v37, %v1685_v47  ;;  %3427 = vmatmul.mubr.msk.bf16.gmra.mxu1 %vm760_vm6, %v1988_v45  ;;  %v1945_v56 = vsel %vm1817_vm7, %v1683_v40, %v1881_v48 }
 0x2bc   :  { %v3368_v52 = vpop.f32.mrf.mxu0 }
 0x2bd   :  { %vm1818_vm9 = vcmp.gt.f32.partialorder %v1686_v50, 0.0  ;;  %v1882_v53 = vmul.f32 0.01, %v1686_v50  ;;  %v1948_v54 = vsel %vm1820_vm5, %v1694_v46, %v1884_v49  ;;  %v1707_v61 = vadd.f32 %v3368_v52, %v3983_v37 }
 0x2be   :  { %v1698_v55 = vpop.f32.mrf.mxu0  ;;  %v1990_v63 = vpack.c.bf16 %v1948_v54, %v1947_v59 }
 0x2bf   :  { %v1946_v57 = vsel %vm1818_vm9, %v1686_v50, %v1882_v53  ;;  %v1699_v58 = vadd.f32 %v3983_v37, %v1698_v55  ;;  %v1887_v5 = vmul.f32 0.01, %v1707_v61  ;;  %vm1823_vm12 = vcmp.gt.f32.partialorder %v1707_v61, 0.0 }
 0x2c0   :  { %v1989_v60 = vpack.c.bf16 %v1946_v57, %v1945_v56  ;;  %v3369_v62 = vpop.f32.mrf.mxu0 }
 0x2c1   :  { %v1710_v0 = vadd.f32 %v3369_v62, %v3983_v37  ;;  %v1885_v2 = vmul.f32 0.01, %v1699_v58  ;;  %vm1821_vm11 = vcmp.gt.f32.partialorder %v1699_v58, 0.0  ;;  %v1951_v13 = vsel %vm1823_vm12, %v1707_v61, %v1887_v5 }
 0x2c2   :  { %v1701_v1 = vpop.f32.mrf.mxu0  ;;  %3430 = vmatprep.mubr.msk.bf16.mxu1 %vm760_vm6, %v1989_v60 }
 0x2c3   :  { %vm1824_vm10 = vcmp.gt.f32.partialorder %v1710_v0, 0.0  ;;  %v1888_v3 = vmul.f32 0.01, %v1710_v0  ;;  %v1702_v4 = vadd.f32 %v3983_v37, %v1701_v1  ;;  %3431 = vmatmul.mubr.msk.bf16.gmra.mxu1 %vm760_vm6, %v1990_v63  ;;  %v1949_v10 = vsel %vm1821_vm11, %v1699_v58, %v1885_v2 }
 0x2c4   :  { %v3372_v6 = vpop.f32.mrf.mxu0 }
 0x2c5   :  { %vm1822_vm13 = vcmp.gt.f32.partialorder %v1702_v4, 0.0  ;;  %v1886_v7 = vmul.f32 0.01, %v1702_v4  ;;  %v1952_v8 = vsel %vm1824_vm10, %v1710_v0, %v1888_v3  ;;  %v1723_v15 = vadd.f32 %v3372_v6, %v3983_v37 }
 0x2c6   :  { %v1714_v9 = vpop.f32.mrf.mxu0  ;;  %v1992_v17 = vpack.c.bf16 %v1952_v8, %v1951_v13 }
 0x2c7   :  { %v1950_v11 = vsel %vm1822_vm13, %v1702_v4, %v1886_v7  ;;  %v1715_v12 = vadd.f32 %v3983_v37, %v1714_v9  ;;  %v1891_v23 = vmul.f32 0.01, %v1723_v15  ;;  %vm1827_vm0 = vcmp.gt.f32.partialorder %v1723_v15, 0.0 }
 0x2c8   :  { %v1991_v14 = vpack.c.bf16 %v1950_v11, %v1949_v10  ;;  %v3373_v16 = vpop.f32.mrf.mxu0 }
 0x2c9   :  { %v1726_v18 = vadd.f32 %v3373_v16, %v3983_v37  ;;  %v1889_v20 = vmul.f32 0.01, %v1715_v12  ;;  %vm1825_vm15 = vcmp.gt.f32.partialorder %v1715_v12, 0.0  ;;  %v1955_v31 = vsel %vm1827_vm0, %v1723_v15, %v1891_v23 }
 0x2ca   :  { %v1717_v19 = vpop.f32.mrf.mxu0  ;;  %3434 = vmatprep.mubr.msk.bf16.mxu1 %vm760_vm6, %v1991_v14 }
 0x2cb   :  { %vm1828_vm14 = vcmp.gt.f32.partialorder %v1726_v18, 0.0  ;;  %v1892_v21 = vmul.f32 0.01, %v1726_v18  ;;  %v1718_v22 = vadd.f32 %v3983_v37, %v1717_v19  ;;  %3435 = vmatmul.mubr.msk.bf16.gmra.mxu1 %vm760_vm6, %v1992_v17  ;;  %v1953_v28 = vsel %vm1825_vm15, %v1715_v12, %v1889_v20 }
 0x2cc   :  { %v3376_v24 = vpop.f32.mrf.mxu0 }
 0x2cd   :  { %vm1826_vm1 = vcmp.gt.f32.partialorder %v1718_v22, 0.0  ;;  %v1890_v25 = vmul.f32 0.01, %v1718_v22  ;;  %v1956_v26 = vsel %vm1828_vm14, %v1726_v18, %v1892_v21  ;;  %v1739_v33 = vadd.f32 %v3376_v24, %v3983_v37 }
 0x2ce   :  { %v1730_v27 = vpop.f32.mrf.mxu0  ;;  %v1994_v35 = vpack.c.bf16 %v1956_v26, %v1955_v31 }
 0x2cf   :  { %v1954_v29 = vsel %vm1826_vm1, %v1718_v22, %v1890_v25  ;;  %v1731_v30 = vadd.f32 %v3983_v37, %v1730_v27  ;;  %v1895_v42 = vmul.f32 0.01, %v1739_v33  ;;  %vm1831_vm4 = vcmp.gt.f32.partialorder %v1739_v33, 0.0 }
 0x2d0   :  { %v1993_v32 = vpack.c.bf16 %v1954_v29, %v1953_v28  ;;  %v3377_v34 = vpop.f32.mrf.mxu0 }
 0x2d1   :  { %v1742_v36 = vadd.f32 %v3377_v34, %v3983_v37  ;;  %v1893_v39 = vmul.f32 0.01, %v1731_v30  ;;  %vm1829_vm3 = vcmp.gt.f32.partialorder %v1731_v30, 0.0  ;;  %v1959_v50 = vsel %vm1831_vm4, %v1739_v33, %v1895_v42 }
 0x2d2   :  { %v1733_v38 = vpop.f32.mrf.mxu0  ;;  %3438 = vmatprep.mubr.msk.bf16.mxu1 %vm760_vm6, %v1993_v32 }
 0x2d3   :  { %vm1832_vm2 = vcmp.gt.f32.partialorder %v1742_v36, 0.0  ;;  %v1896_v40 = vmul.f32 0.01, %v1742_v36  ;;  %v1734_v41 = vadd.f32 %v3983_v37, %v1733_v38  ;;  %3439 = vmatmul.mubr.msk.bf16.gmra.mxu1 %vm760_vm6, %v1994_v35  ;;  %v1957_v47 = vsel %vm1829_vm3, %v1731_v30, %v1893_v39 }
 0x2d4   :  { %v3380_v43 = vpop.f32.mrf.mxu0 }
 0x2d5   :  { %vm1830_vm5 = vcmp.gt.f32.partialorder %v1734_v41, 0.0  ;;  %v1894_v44 = vmul.f32 0.01, %v1734_v41  ;;  %v1960_v45 = vsel %vm1832_vm2, %v1742_v36, %v1896_v40  ;;  %v1755_v52 = vadd.f32 %v3380_v43, %v3983_v37 }
 0x2d6   :  { %v1746_v46 = vpop.f32.mrf.mxu0  ;;  %v1996_v54 = vpack.c.bf16 %v1960_v45, %v1959_v50 }
 0x2d7   :  { %v1958_v48 = vsel %vm1830_vm5, %v1734_v41, %v1894_v44  ;;  %v1747_v49 = vadd.f32 %v3983_v37, %v1746_v46  ;;  %v1899_v60 = vmul.f32 0.01, %v1755_v52  ;;  %vm1835_vm9 = vcmp.gt.f32.partialorder %v1755_v52, 0.0 }
 0x2d8   :  { %v1995_v51 = vpack.c.bf16 %v1958_v48, %v1957_v47  ;;  %v3381_v53 = vpop.f32.mrf.mxu0 }
 0x2d9   :  { %v1758_v55 = vadd.f32 %v3381_v53, %v3983_v37  ;;  %v1897_v57 = vmul.f32 0.01, %v1747_v49  ;;  %vm1833_vm8 = vcmp.gt.f32.partialorder %v1747_v49, 0.0  ;;  %v1963_v4 = vsel %vm1835_vm9, %v1755_v52, %v1899_v60 }
 0x2da   :  { %v1749_v56 = vpop.f32.mrf.mxu0  ;;  %3442 = vmatprep.mubr.msk.bf16.mxu1 %vm760_vm6, %v1995_v51 }
 0x2db   :  { %vm1836_vm7 = vcmp.gt.f32.partialorder %v1758_v55, 0.0  ;;  %v1900_v58 = vmul.f32 0.01, %v1758_v55  ;;  %v1750_v59 = vadd.f32 %v3983_v37, %v1749_v56  ;;  %3443 = vmatmul.mubr.msk.bf16.gmra.mxu1 %vm760_vm6, %v1996_v54  ;;  %v1961_v1 = vsel %vm1833_vm8, %v1747_v49, %v1897_v57 }
 0x2dc   :  { %v3384_v61 = vpop.f32.mrf.mxu0 }
 0x2dd   :  { %vm1834_vm10 = vcmp.gt.f32.partialorder %v1750_v59, 0.0  ;;  %v1898_v62 = vmul.f32 0.01, %v1750_v59  ;;  %v1964_v63 = vsel %vm1836_vm7, %v1758_v55, %v1900_v58  ;;  %v1771_v6 = vadd.f32 %v3384_v61, %v3983_v37 }
 0x2de   :  { %v1762_v0 = vpop.f32.mrf.mxu0  ;;  %v1998_v8 = vpack.c.bf16 %v1964_v63, %v1963_v4 }
 0x2df   :  { %v1962_v2 = vsel %vm1834_vm10, %v1750_v59, %v1898_v62  ;;  %v1763_v3 = vadd.f32 %v3983_v37, %v1762_v0  ;;  %v1903_v14 = vmul.f32 0.01, %v1771_v6  ;;  %vm1839_vm13 = vcmp.gt.f32.partialorder %v1771_v6, 0.0 }
 0x2e0   :  { %v1997_v5 = vpack.c.bf16 %v1962_v2, %v1961_v1  ;;  %v3385_v7 = vpop.f32.mrf.mxu0 }
 0x2e1   :  { %v1774_v9 = vadd.f32 %v3385_v7, %v3983_v37  ;;  %v1901_v11 = vmul.f32 0.01, %v1763_v3  ;;  %vm1837_vm12 = vcmp.gt.f32.partialorder %v1763_v3, 0.0  ;;  %v1967_v19 = vsel %vm1839_vm13, %v1771_v6, %v1903_v14 }
 0x2e2   :  { %v1765_v10 = vpop.f32.mrf.mxu0  ;;  %3446 = vmatprep.mubr.msk.bf16.mxu1 %vm760_vm6, %v1997_v5 }
 0x2e3   :  { %vm1840_vm11 = vcmp.gt.f32.partialorder %v1774_v9, 0.0  ;;  %v1904_v12 = vmul.f32 0.01, %v1774_v9  ;;  %v1766_v13 = vadd.f32 %v3983_v37, %v1765_v10  ;;  %3447 = vmatmul.mubr.msk.bf16.gmra.mxu1 %vm760_vm6, %v1998_v8  ;;  %v1965_v17 = vsel %vm1837_vm12, %v1763_v3, %v1901_v11  ;;  %v4084_v37 = vld [vmem:[%s4388_s3 + $0x3] ss:$0 sm:$0xff] }
 0x2e5   :  { %vm1838_vm14 = vcmp.gt.f32.partialorder %v1766_v13, 0.0  ;;  %v1902_v15 = vmul.f32 0.01, %v1766_v13  ;;  %v1968_v16 = vsel %vm1840_vm11, %v1774_v9, %v1904_v12 }
 0x2e6   :  { %v2000_v21 = vpack.c.bf16 %v1968_v16, %v1967_v19 }
 0x2e7   :  { %v1966_v18 = vsel %vm1838_vm14, %v1766_v13, %v1902_v15 }
 0x2e8   :  { %v1999_v20 = vpack.c.bf16 %v1966_v18, %v1965_v17 }
 0x2ea   :  { %3450 = vmatprep.mubr.msk.bf16.mxu1 %vm760_vm6, %v1999_v20 }
 0x2eb   :  { %3451 = vmatmul.mubr.msk.bf16.gmra.mxu1 %vm760_vm6, %v2000_v21 }
 0x333   :  { %v3392_v22 = vpop.f32.mrf.mxu1 }
 0x334   :  { %v2162_v23 = vadd.f32 %v3392_v22, %v4084_v37 }
 0x335   :  { %v2153_v24 = vpop.f32.mrf.mxu1 }
 0x336   :  { %v2154_v25 = vadd.f32 %v4084_v37, %v2153_v24  ;;  %v2474_v26 = vmul.f32 0.01, %v2162_v23  ;;  %vm2410_vm15 = vcmp.gt.f32.partialorder %v2162_v23, 0.0 }
 0x337   :  { %v3393_v27 = vpop.f32.mrf.mxu1 }
 0x338   :  { %v2165_v28 = vadd.f32 %v3393_v27, %v4084_v37  ;;  %v2472_v30 = vmul.f32 0.01, %v2154_v25  ;;  %v4090_v33 = vsel %vm2410_vm15, %v2162_v23, %v2474_v26  ;;  %vm2408_vm1 = vcmp.gt.f32.partialorder %v2154_v25, 0.0 }
 0x339   :  { %v2156_v29 = vpop.f32.mrf.mxu1 }
 0x33a   :  { %vm2411_vm0 = vcmp.gt.f32.partialorder %v2165_v28, 0.0  ;;  %v2475_v31 = vmul.f32 0.01, %v2165_v28  ;;  %v2157_v32 = vadd.f32 %v4084_v37, %v2156_v29  ;;  %v4097_v41 = vsel %vm2408_vm1, %v2154_v25, %v2472_v30 }
 0x33b   :  { %v3396_v34 = vpop.f32.mrf.mxu1 }
 0x33c   :  { %v4092_v35 = vsel %vm2411_vm0, %v2165_v28, %v2475_v31  ;;  %vm2409_vm2 = vcmp.gt.f32.partialorder %v2157_v32, 0.0  ;;  %v2473_v36 = vmul.f32 0.01, %v2157_v32  ;;  %v2178_v38 = vadd.f32 %v3396_v34, %v4084_v37 }
 0x33d   :  { %v2169_v39 = vpop.f32.mrf.mxu1  ;;  %v2603_v40 = vpack.c.bf16 %v4092_v35, %v4090_v33 }
 0x33e   :  { %v4099_v42 = vsel %vm2409_vm2, %v2157_v32, %v2473_v36  ;;  %v2170_v43 = vadd.f32 %v4084_v37, %v2169_v39  ;;  %v2478_v46 = vmul.f32 0.01, %v2178_v38  ;;  %vm2414_vm3 = vcmp.gt.f32.partialorder %v2178_v38, 0.0 }
 0x33f   :  { %v3397_v44 = vpop.f32.mrf.mxu1  ;;  %v2602_v45 = vpack.c.bf16 %v4099_v42, %v4097_v41 }
 0x340   :  { %v2181_v47 = vadd.f32 %v3397_v44, %v4084_v37  ;;  %v2476_v49 = vmul.f32 0.01, %v2170_v43  ;;  %vm2412_vm5 = vcmp.gt.f32.partialorder %v2170_v43, 0.0  ;;  %v4106_v53 = vsel %vm2414_vm3, %v2178_v38, %v2478_v46  ;;  %v2600_v46 = vld [vmem:[%s4388_s3 + $0x4] sm:$0x1] }
 0x341   :  { %v2172_v48 = vpop.f32.mrf.mxu1 }
 0x342   :  { %vm2415_vm4 = vcmp.gt.f32.partialorder %v2181_v47, 0.0  ;;  %v2479_v50 = vmul.f32 0.01, %v2181_v47  ;;  %v2173_v51 = vadd.f32 %v4084_v37, %v2172_v48  ;;  %v4112_v58 = vsel %vm2412_vm5, %v2170_v43, %v2476_v49 }
 0x343   :  { %v3400_v52 = vpop.f32.mrf.mxu1 }
 0x344   :  { %v4108_v54 = vsel %vm2415_vm4, %v2181_v47, %v2479_v50  ;;  %vm2413_vm7 = vcmp.gt.f32.partialorder %v2173_v51, 0.0  ;;  %v2477_v55 = vmul.f32 0.01, %v2173_v51  ;;  %v4151_v31 = vadd.f32 %v3400_v52, %v4084_v37 }
 0x345   :  { %v2185_v56 = vpop.f32.mrf.mxu1  ;;  %v2605_v57 = vpack.c.bf16 %v4108_v54, %v4106_v53  ;;  %v4166_v52 = vpack.c.bf16 %v2600_v46, %v2600_v46 }
 0x346   :  { %v4114_v59 = vsel %vm2413_vm7, %v2173_v51, %v2477_v55  ;;  %v4161_v48 = vmul.f32 0.01, %v4151_v31  ;;  %v4164_v49 = vadd.f32 %v4084_v37, %v2185_v56  ;;  %vm2418_vm3 = vcmp.gt.f32.partialorder %v4151_v31, 0.0 }
 0x347   :  { %v3401_v60 = vpop.f32.mrf.mxu1  ;;  %v2604_v61 = vpack.c.bf16 %v4114_v59, %v4112_v58  ;;  %3164 = vmatprep.mubr.msk.bf16.mxu0 %vm760_vm6, %v4166_v52  ;;  %3182 = vmatprep.mubr.msk.bf16.mxu1 %vm760_vm6, %v4166_v52 }
 0x348   :  { %v4169_v55 = vadd.f32 %v3401_v60, %v4084_v37 }
 0x349   :  { %v4118_v62 = vpop.f32.mrf.mxu1 }
 0x34a   :  { %vm2419_vm4 = vcmp.gt.f32.partialorder %v4169_v55, 0.0 }
 0x34b   :  { %v3404_v63 = vpop.f32.mrf.mxu1 }
 0x34c   :  { %v2210_v29 = vadd.f32 %v3404_v63, %v4084_v37 }
 0x34d   :  { %v2201_v0 = vpop.f32.mrf.mxu1 }
 0x34e   :  { %v2486_v38 = vmul.f32 0.01, %v2210_v29  ;;  %v2202_v39 = vadd.f32 %v4084_v37, %v2201_v0  ;;  %vm2422_vm13 = vcmp.gt.f32.partialorder %v2210_v29, 0.0 }
 0x34f   :  { %v3405_v1 = vpop.f32.mrf.mxu1 }
 0x350   :  { %v2213_v28 = vadd.f32 %v3405_v1, %v4084_v37  ;;  %v2550_v1 = vsel %vm2422_vm13, %v2210_v29, %v2486_v38  ;;  %vm2420_vm5 = vcmp.gt.f32.partialorder %v2202_v39, 0.0 }
 0x351   :  { %v2204_v2 = vpop.f32.mrf.mxu1 }
 0x352   :  { %v2487_v34 = vmul.f32 0.01, %v2213_v28  ;;  %vm2423_vm12 = vcmp.gt.f32.partialorder %v2213_v28, 0.0  ;;  %v2205_v43 = vadd.f32 %v4084_v37, %v2204_v2  ;;  %v2484_v2 = vmul.f32 0.01, %v2202_v39 }
 0x353   :  { %v3408_v3 = vpop.f32.mrf.mxu1 }
 0x354   :  { %v2226_v4 = vadd.f32 %v3408_v3, %v4084_v37  ;;  %v2551_v63 = vsel %vm2423_vm12, %v2213_v28, %v2487_v34  ;;  %vm2421_vm15 = vcmp.gt.f32.partialorder %v2205_v43, 0.0  ;;  %v2485_v3 = vmul.f32 0.01, %v2205_v43 }
 0x355   :  { %v2217_v5 = vpop.f32.mrf.mxu1 }
 0x356   :  { %v2218_v6 = vadd.f32 %v4084_v37, %v2217_v5  ;;  %v2490_v8 = vmul.f32 0.01, %v2226_v4  ;;  %vm2426_vm8 = vcmp.gt.f32.partialorder %v2226_v4, 0.0 }
 0x357   :  { %v3409_v7 = vpop.f32.mrf.mxu1 }
 0x358   :  { %v2229_v9 = vadd.f32 %v3409_v7, %v4084_v37  ;;  %v2488_v11 = vmul.f32 0.01, %v2218_v6  ;;  %vm2424_vm10 = vcmp.gt.f32.partialorder %v2218_v6, 0.0  ;;  %v4126_v15 = vsel %vm2426_vm8, %v2226_v4, %v2490_v8 }
 0x359   :  { %v2220_v10 = vpop.f32.mrf.mxu1 }
 0x35a   :  { %vm2427_vm9 = vcmp.gt.f32.partialorder %v2229_v9, 0.0  ;;  %v2491_v12 = vmul.f32 0.01, %v2229_v9  ;;  %v2221_v13 = vadd.f32 %v4084_v37, %v2220_v10  ;;  %v4134_v20 = vsel %vm2424_vm10, %v2218_v6, %v2488_v11 }
 0x35b   :  { %v4124_v14 = vpop.f32.mrf.mxu1 }
 0x35c   :  { %v4128_v16 = vsel %vm2427_vm9, %v2229_v9, %v2491_v12  ;;  %vm2425_vm11 = vcmp.gt.f32.partialorder %v2221_v13, 0.0  ;;  %v2489_v17 = vmul.f32 0.01, %v2221_v13  ;;  %v2609_v9 = vpack.c.bf16 %v2551_v63, %v2550_v1 }
 0x35d   :  { %v2611_v18 = vpack.c.bf16 %v4128_v16, %v4126_v15  ;;  %v4132_v19 = vpop.f32.mrf.mxu1 }
 0x35e   :  { %v4136_v21 = vsel %vm2425_vm11, %v2221_v13, %v2489_v17 }
 0x35f   :  { %v2610_v22 = vpack.c.bf16 %v4136_v21, %v4134_v20  ;;  %v4140_v23 = vpop.f32.mrf.mxu1  ;;  %v2640_v20 = vsel %vm760_vm6, %v2602_v45, 0 }
 0x361   :  { %v4142_v24 = vpop.f32.mrf.mxu1 }
 0x363   :  { %v3416_v25 = vpop.f32.mrf.mxu1 }
 0x364   :  { %v2258_v13 = vadd.f32 %v3416_v25, %v4084_v37 }
 0x365   :  { %v4144_v26 = vpop.f32.mrf.mxu1 }
 0x366   :  { %vm2434_vm9 = vcmp.gt.f32.partialorder %v2258_v13, 0.0 }
 0x367   :  { %v3417_v27 = vpop.f32.mrf.mxu1 }
 0x368   :  { %v2261_v6 = vadd.f32 %v3417_v27, %v4084_v37  ;;  %v2549_v27 = vsel %vm2421_vm15, %v2205_v43, %v2485_v3  ;;  %v2483_v43 = vmul.f32 0.01, %v4169_v55 }
 0x369   :  { %v4148_v30 = vpop.f32.mrf.mxu1 }
 0x36a   :  { %vm2435_vm7 = vcmp.gt.f32.partialorder %v2261_v6, 0.0 }
 0x36b   :  { %v3420_v32 = vpop.f32.mrf.mxu1 }
 0x36c   :  { %v2274_v36 = vadd.f32 %v3420_v32, %v4084_v37 }
 0x36d   :  { %v2265_v44 = vpop.f32.mrf.mxu1 }
 0x36e   :  { %v2266_v47 = vadd.f32 %v4084_v37, %v2265_v44  ;;  %v2502_v50 = vmul.f32 0.01, %v2274_v36  ;;  %vm2438_vm14 = vcmp.gt.f32.partialorder %v2274_v36, 0.0 }
 0x36f   :  { %v3421_v51 = vpop.f32.mrf.mxu1 }
 0x370   :  { %v2277_v0 = vadd.f32 %v3421_v51, %v4084_v37  ;;  %v2500_v56 = vmul.f32 0.01, %v2266_v47  ;;  %v2566_v7 = vsel %vm2438_vm14, %v2274_v36, %v2502_v50  ;;  %vm2436_vm1 = vcmp.gt.f32.partialorder %v2266_v47, 0.0 }
 0x371   :  { %v2268_v4 = vpop.f32.mrf.mxu1  ;;  %v2499_v36 = vmul.f32 0.01, %v2261_v6  ;;  %v2661_v50 = vsel %vm760_vm6, %v2609_v9, 0  ;;  %v2548_v51 = vsel %vm2420_vm5, %v2202_v39, %v2484_v2  ;;  %v2253_v39 = vadd.f32 %v4084_v37, %v4148_v30 }
 0x372   :  { %vm2439_vm0 = vcmp.gt.f32.partialorder %v2277_v0, 0.0  ;;  %v2503_v5 = vmul.f32 0.01, %v2277_v0  ;;  %v2269_v60 = vadd.f32 %v4084_v37, %v2268_v4  ;;  %v2564_v29 = vsel %vm2436_vm1, %v2266_v47, %v2500_v56 }
 0x373   :  { %v3424_v8 = vpop.f32.mrf.mxu1  ;;  %v2498_v47 = vmul.f32 0.01, %v2258_v13  ;;  %v2563_v56 = vsel %vm2435_vm7, %v2261_v6, %v2499_v36  ;;  %v2547_v9 = vsel %vm2419_vm4, %v4169_v55, %v2483_v43  ;;  %v2189_v6 = vadd.f32 %v4084_v37, %v4118_v62 }
 0x374   :  { %v2567_v10 = vsel %vm2439_vm0, %v2277_v0, %v2503_v5  ;;  %vm2437_vm2 = vcmp.gt.f32.partialorder %v2269_v60, 0.0  ;;  %v2501_v11 = vmul.f32 0.01, %v2269_v60  ;;  %v2290_v12 = vadd.f32 %v3424_v8, %v4084_v37 }
 0x375   :  { %v2617_v17 = vpack.c.bf16 %v2567_v10, %v2566_v7  ;;  %v2281_v28 = vpop.f32.mrf.mxu1  ;;  %v2608_v0 = vpack.c.bf16 %v2549_v27, %v2548_v51  ;;  %v2250_v30 = vadd.f32 %v4084_v37, %v4144_v26  ;;  %v2497_v55 = vmul.f32 0.01, %v2253_v39 }
 0x376   :  { %v2565_v32 = vsel %vm2437_vm2, %v2269_v60, %v2501_v11  ;;  %v2282_v34 = vadd.f32 %v4084_v37, %v2281_v28  ;;  %v2506_v44 = vmul.f32 0.01, %v2290_v12  ;;  %vm2442_vm8 = vcmp.gt.f32.partialorder %v2290_v12, 0.0 }
 0x377   :  { %v2616_v38 = vpack.c.bf16 %v2565_v32, %v2564_v29  ;;  %v3425_v46 = vpop.f32.mrf.mxu1  ;;  %3455 = vmatprep.subr.msk.bf16.mxu0 %vm760_vm6, %v2617_v17  ;;  %v2658_v62 = vsel %vm760_vm6, %v2608_v0, 0  ;;  %v2546_v36 = vsel %vm2418_vm3, %v4151_v31, %v4161_v48  ;;  %vm2433_vm13 = vcmp.gt.f32.partialorder %v2253_v39, 0.0 }
 0x378   :  { %v2293_v25 = vadd.f32 %v3425_v46, %v4084_v37  ;;  %3149 = vmatpush3.bf16.xpose.msra.mxu0 %v2661_v50  ;;  %v2504_v1 = vmul.f32 0.01, %v2282_v34  ;;  %v4192_v2 = vsel %vm2442_vm8, %v2290_v12, %v2506_v44  ;;  %vm2440_vm11 = vcmp.gt.f32.partialorder %v2282_v34, 0.0 }
 0x379   :  { %v2284_v63 = vpop.f32.mrf.mxu1  ;;  %3456 = vmatprep.subr.msk.bf16.mxu0 %vm760_vm6, %v2616_v38  ;;  %v2562_v12 = vsel %vm2434_vm9, %v2258_v13, %v2498_v47  ;;  %v2481_v38 = vmul.f32 0.01, %v2189_v6  ;;  %v2496_v44 = vmul.f32 0.01, %v2250_v30  ;;  %v2607_v50 = vpack.c.bf16 %v2547_v9, %v2546_v36 }
 0x37a   :  { %vm2443_vm10 = vcmp.gt.f32.partialorder %v2293_v25, 0.0  ;;  %v2507_v3 = vmul.f32 0.01, %v2293_v25  ;;  %v2285_v4 = vadd.f32 %v4084_v37, %v2284_v63  ;;  %v4207_v17 = vsel %vm2440_vm11, %v2282_v34, %v2504_v1 }
 0x37b   :  { %v3428_v5 = vpop.f32.mrf.mxu1  ;;  %v2615_v29 = vpack.c.bf16 %v2563_v56, %v2562_v12  ;;  %v2245_v31 = vadd.f32 %v4140_v23, %v4084_v37  ;;  %vm2432_vm0 = vcmp.gt.f32.partialorder %v2250_v30, 0.0  ;;  %v2561_v48 = vsel %vm2433_vm13, %v2253_v39, %v2497_v55 }
 0x37c   :  { %v4194_v60 = vsel %vm2443_vm10, %v2293_v25, %v2507_v3  ;;  %vm2441_vm12 = vcmp.gt.f32.partialorder %v2285_v4, 0.0  ;;  %v2505_v7 = vmul.f32 0.01, %v2285_v4  ;;  %v2306_v8 = vadd.f32 %v3428_v5, %v4084_v37 }
 0x37d   :  { %v2297_v10 = vpop.f32.mrf.mxu1  ;;  %v2619_v11 = vpack.c.bf16 %v4194_v60, %v4192_v2  ;;  %v2480_v3 = vmul.f32 0.01, %v4164_v49  ;;  %vm2417_vm3 = vcmp.gt.f32.partialorder %v2189_v6, 0.0  ;;  %v2242_v56 = vadd.f32 %v4124_v14, %v4084_v37 }
 0x37e   :  { %v4209_v28 = vsel %vm2441_vm12, %v2285_v4, %v2505_v7  ;;  %v2298_v27 = vadd.f32 %v4084_v37, %v2297_v10  ;;  %v2510_v13 = vmul.f32 0.01, %v2306_v8  ;;  %vm2446_vm14 = vcmp.gt.f32.partialorder %v2306_v8, 0.0 }
 0x37f   :  { %v3429_v32 = vpop.f32.mrf.mxu1  ;;  %v2618_v26 = vpack.c.bf16 %v4209_v28, %v4207_v17  ;;  %v2560_v39 = vsel %vm2432_vm0, %v2250_v30, %v2496_v44  ;;  %vm2416_vm4 = vcmp.gt.f32.partialorder %v4164_v49, 0.0  ;;  %v2655_v10 = vsel %vm760_vm6, %v2607_v50, 0 }
 0x380   :  { %v2309_v34 = vadd.f32 %v3429_v32, %v4084_v37  ;;  %3151 = vmatpush3.bf16.xpose.msra.mxu0 %v2658_v62  ;;  %v2508_v51 = vmul.f32 0.01, %v2298_v27  ;;  %vm2444_vm1 = vcmp.gt.f32.partialorder %v2298_v27, 0.0  ;;  %v4227_v63 = vsel %vm2446_vm14, %v2306_v8, %v2510_v13 }
 0x381   :  { %v2300_v46 = vpop.f32.mrf.mxu1  ;;  %3457 = vmatprep.subr.msk.bf16.mxu0 %vm760_vm6, %v2615_v29  ;;  %v2614_v8 = vpack.c.bf16 %v2561_v48, %v2560_v39  ;;  %v2545_v29 = vsel %vm2417_vm3, %v2189_v6, %v2481_v38  ;;  %v2495_v55 = vmul.f32 0.01, %v2245_v31  ;;  %vm2431_vm5 = vcmp.gt.f32.partialorder %v2245_v31, 0.0 }
 0x382   :  { %vm2447_vm15 = vcmp.gt.f32.partialorder %v2309_v34, 0.0  ;;  %v2511_v25 = vmul.f32 0.01, %v2309_v34  ;;  %v2301_v43 = vadd.f32 %v4084_v37, %v2300_v46  ;;  %v4238_v5 = vsel %vm2444_vm1, %v2298_v27, %v2508_v51 }
 0x383   :  { %v4225_v47 = vpop.f32.mrf.mxu1  ;;  %v2544_v30 = vsel %vm2416_vm4, %v4164_v49, %v2480_v3  ;;  %v2494_v27 = vmul.f32 0.01, %v2242_v56  ;;  %vm2430_vm7 = vcmp.gt.f32.partialorder %v2242_v56, 0.0  ;;  %v2559_v36 = vsel %vm2431_vm5, %v2245_v31, %v2495_v55 }
 0x384   :  { %v4229_v0 = vsel %vm2447_vm15, %v2309_v34, %v2511_v25  ;;  %vm2445_vm2 = vcmp.gt.f32.partialorder %v2301_v43, 0.0  ;;  %v2509_v1 = vmul.f32 0.01, %v2301_v43  ;;  %v2606_v62 = vpack.c.bf16 %v2545_v29, %v2544_v30 }
 0x385   :  { %v4232_v4 = vpop.f32.mrf.mxu1  ;;  %v2621_v23 = vpack.c.bf16 %v4229_v0, %v4227_v63  ;;  %v2237_v13 = vadd.f32 %v4084_v37, %v4142_v24  ;;  %v2558_v6 = vsel %vm2430_vm7, %v2242_v56, %v2494_v27  ;;  %v2234_v38 = vadd.f32 %v4084_v37, %v4132_v19 }
 0x386   :  { %v4240_v7 = vsel %vm2445_vm2, %v2301_v43, %v2509_v1  ;;  %v2613_v44 = vpack.c.bf16 %v2559_v36, %v2558_v6  ;;  %v2652_v50 = vsel %vm760_vm6, %v2606_v62, 0  ;;  %v2649_v39 = vsel %vm760_vm6, %v2605_v57, 0 }
 0x387   :  { %v4243_v9 = vpop.f32.mrf.mxu1  ;;  %v2620_v12 = vpack.c.bf16 %v4240_v7, %v4238_v5  ;;  %v2493_v51 = vmul.f32 0.01, %v2237_v13  ;;  %vm2429_vm8 = vcmp.gt.f32.partialorder %v2237_v13, 0.0  ;;  %v2492_v25 = vmul.f32 0.01, %v2234_v38 }
 0x388   :  { %3153 = vmatpush3.bf16.xpose.msra.mxu0 %v2655_v10  ;;  %vm2428_vm9 = vcmp.gt.f32.partialorder %v2234_v38, 0.0  ;;  %v2691_v63 = vsel %vm760_vm6, %v2619_v11, 0  ;;  %v2688_v0 = vsel %vm760_vm6, %v2618_v26, 0  ;;  %v2635_v2 = vstv %s4389_s4  ;;  %s3502_s4 = smov [#allocation3]  }
 0x389   :  { %v4248_v14 = vpop.f32.mrf.mxu1  ;;  %3458 = vmatprep.subr.msk.bf16.mxu0 %vm760_vm6, %v2614_v8  ;;  %v2557_v24 = vsel %vm2429_vm8, %v2237_v13, %v2493_v51  ;;  %v2556_v1 = vsel %vm2428_vm9, %v2234_v38, %v2492_v25  ;;  %v2646_v51 = vsel %vm760_vm6, %v2604_v61, 0  ;;  %v2826_v17 = vlaneseq  ;;  %s2857_s13 = sshll.u32 %s3502_s4, 4  ;;  %s2858_s13 = int_to_ptr.vmem [resolvable:$true] %s2857_s13 }
 0x38a   :  { %v2612_v3 = vpack.c.bf16 %v2557_v24, %v2556_v1  ;;  %s3479_s14 = scalar_lea.vmem %s2858_s13, 64  ;;  %p3484_p1 = scmp.lt.s32.totalorder %s2858_s13, %s2858_s13 }
 0x38b   :  { %v3436_v32 = vpop.f32.mrf.mxu1  ;;  %v2827_v26 = vshrl.u32 %v2826_v17, 7  ;;  %p3480_p0 = scmp.ne.s32.totalorder %s2858_s13, %s3479_s14  ;;  %p3485_p2 = scmp.lt.s32.totalorder %s3479_s14, %s3479_s14 }
 0x38c   :  { %v2338_v59 = vadd.f32 %v3436_v32, %v4084_v37 }
 0x38d   :  { %v4254_v34 = vpop.f32.mrf.mxu1  ;;  %p3486_p3 = por %p3485_p2, %p3484_p1 }
 0x38e   :  { %v2518_v1 = vmul.f32 0.01, %v2338_v59  ;;  %vm2454_vm15 = vcmp.gt.f32.partialorder %v2338_v59, 0.0 }
 0x38f   :  { %v3437_v46 = vpop.f32.mrf.mxu1  ;;  %p3487_p4 = pnand %p3486_p3, %p3480_p0 }
 0x390   :  { %3155 = vmatpush3.bf16.xpose.msra.mxu0 %v2652_v50  ;;  %v2341_v58 = vadd.f32 %v3437_v46, %v4084_v37 }
 0x391   :  { %v2332_v49 = vpop.f32.mrf.mxu1  ;;  %3459 = vmatprep.subr.msk.bf16.mxu0 %vm760_vm6, %v2613_v44 }
 0x392   :  { %v2519_v16 = vmul.f32 0.01, %v2341_v58  ;;  %vm2455_vm14 = vcmp.gt.f32.partialorder %v2341_v58, 0.0 }
 0x393   :  { %v3440_v43 = vpop.f32.mrf.mxu1 }
 0x394   :  { %v2354_v31 = vadd.f32 %v3440_v43, %v4084_v37  ;;  %v2583_v21 = vsel %vm2455_vm14, %v2341_v58, %v2519_v16 }
 0x395   :  { %v2345_v48 = vpop.f32.mrf.mxu1 }
 0x396   :  { %v2346_v19 = vadd.f32 %v4084_v37, %v2345_v48  ;;  %v2522_v8 = vmul.f32 0.01, %v2354_v31  ;;  %vm2458_vm10 = vcmp.gt.f32.partialorder %v2354_v31, 0.0  ;;  %v2643_v48 = vsel %vm760_vm6, %v2603_v40, 0 }
 0x397   :  { %v3441_v56 = vpop.f32.mrf.mxu1  ;;  %v2333_v40 = vadd.f32 %v4084_v37, %v2332_v49 }
 0x398   :  { %v2357_v10 = vadd.f32 %v3441_v56, %v4084_v37  ;;  %3157 = vmatpush3.bf16.xpose.msra.mxu0 %v2649_v39  ;;  %v2520_v55 = vmul.f32 0.01, %v2346_v19  ;;  %vm2456_vm12 = vcmp.gt.f32.partialorder %v2346_v19, 0.0  ;;  %v4271_v36 = vsel %vm2458_vm10, %v2354_v31, %v2522_v8 }
 0x399   :  { %v2348_v29 = vpop.f32.mrf.mxu1  ;;  %3460 = vmatprep.subr.msk.bf16.mxu0 %vm760_vm6, %v2612_v3  ;;  %v2330_v3 = vadd.f32 %v4084_v37, %v4254_v34  ;;  %vm2453_vm4 = vcmp.gt.f32.partialorder %v2333_v40, 0.0 }
 0x39a   :  { %vm2459_vm11 = vcmp.gt.f32.partialorder %v2357_v10, 0.0  ;;  %v2523_v30 = vmul.f32 0.01, %v2357_v10  ;;  %v2349_v27 = vadd.f32 %v4084_v37, %v2348_v29  ;;  %v4279_v6 = vsel %vm2456_vm12, %v2346_v19, %v2520_v55 }
 0x39b   :  { %v4269_v62 = vpop.f32.mrf.mxu1  ;;  %v2582_v19 = vsel %vm2454_vm15, %v2338_v59, %v2518_v1  ;;  %vm2452_vm5 = vcmp.gt.f32.partialorder %v2330_v3, 0.0 }
 0x39c   :  { %v4273_v53 = vsel %vm2459_vm11, %v2357_v10, %v2523_v30  ;;  %vm2457_vm13 = vcmp.gt.f32.partialorder %v2349_v27, 0.0  ;;  %v2521_v54 = vmul.f32 0.01, %v2349_v27  ;;  %v2517_v10 = vmul.f32 0.01, %v2333_v40 }
 0x39d   :  { %v2627_v57 = vpack.c.bf16 %v4273_v53, %v4271_v36  ;;  %v4277_v13 = vpop.f32.mrf.mxu1  ;;  %v2625_v42 = vpack.c.bf16 %v2583_v21, %v2582_v19  ;;  %v3501_v53 = vmov 1966171168  }
 0x39e   :  { %v4281_v38 = vsel %vm2457_vm13, %v2349_v27, %v2521_v54  ;;  %v2516_v27 = vmul.f32 0.01, %v2330_v3  ;;  %v2581_v59 = vsel %vm2453_vm4, %v2333_v40, %v2517_v10 }
 0x39f   :  { %v2626_v44 = vpack.c.bf16 %v4281_v38, %v4279_v6  ;;  %v4285_v50 = vpop.f32.mrf.mxu1  ;;  %v2709_v58 = vsel %vm760_vm6, %v2625_v42, 0 }
 0x3a0   :  { %3159 = vmatpush3.bf16.xpose.msra.mxu0 %v2646_v51  ;;  %v2580_v16 = vsel %vm2452_vm5, %v2330_v3, %v2516_v27  ;;  %v2314_v3 = vadd.f32 %v4084_v37, %v4232_v4 }
 0x3a1   :  { %v4291_v25 = vpop.f32.mrf.mxu1  ;;  %3461 = vmatprep.subr.msk.bf16.mxu0 %vm760_vm6, %v2611_v18  ;;  %v2624_v1 = vpack.c.bf16 %v2581_v59, %v2580_v16 }
 0x3a2   :  { %v2512_v10 = vmul.f32 0.01, %v2314_v3  ;;  %vm2448_vm14 = vcmp.gt.f32.partialorder %v2314_v3, 0.0 }
 0x3a3   :  { %v3448_v43 = vpop.f32.mrf.mxu1 }
 0x3a4   :  { %v2386_v34 = vadd.f32 %v3448_v43, %v4084_v37  ;;  %v2322_v43 = vadd.f32 %v4225_v47, %v4084_v37  ;;  %v2317_v47 = vadd.f32 %v4084_v37, %v4248_v14  ;;  %v2370_v14 = vadd.f32 %v4269_v62, %v4084_v37 }
 0x3a5   :  { %v4297_v24 = vpop.f32.mrf.mxu1 }
 0x3a6   :  { %vm2466_vm8 = vcmp.gt.f32.partialorder %v2386_v34, 0.0  ;;  %v2378_v40 = vadd.f32 %v4084_v37, %v4297_v24  ;;  %vm2450_vm10 = vcmp.gt.f32.partialorder %v2322_v43, 0.0  ;;  %vm2449_vm13 = vcmp.gt.f32.partialorder %v2317_v47, 0.0 }
 0x3a7   :  { %v3449_v31 = vpop.f32.mrf.mxu1 }
 0x3a8   :  { %3161 = vmatpush3.bf16.xpose.msra.mxu0 %v2643_v48  ;;  %v2389_v41 = vadd.f32 %v3449_v31, %v4084_v37  ;;  %v2325_v31 = vadd.f32 %v4243_v9, %v4084_v37  ;;  %vm2464_vm12 = vcmp.gt.f32.partialorder %v2378_v40, 0.0 }
 0x3a9   :  { %v2380_v61 = vpop.f32.mrf.mxu1  ;;  %3462 = vmatprep.subr.msk.bf16.mxu0 %vm760_vm6, %v2610_v22 }
 0x3aa   :  { %vm2467_vm7 = vcmp.gt.f32.partialorder %v2389_v41, 0.0  ;;  %vm2451_vm9 = vcmp.gt.f32.partialorder %v2325_v31, 0.0 }
 0x3ab   :  { %v3452_v15 = vpop.f32.mrf.mxu1 }
 0x3ac   :  { %v2402_v18 = vadd.f32 %v3452_v15, %v4084_v37  ;;  %v2531_v15 = vmul.f32 0.01, %v2389_v41 }
 0x3ad   :  { %v2393_v33 = vpop.f32.mrf.mxu1 }
 0x3ae   :  { %v2394_v35 = vadd.f32 %v4084_v37, %v2393_v33  ;;  %v2534_v22 = vmul.f32 0.01, %v2402_v18  ;;  %vm2470_vm0 = vcmp.gt.f32.partialorder %v2402_v18, 0.0  ;;  %v2515_v33 = vmul.f32 0.01, %v2325_v31 }
 0x3af   :  { %v3453_v46 = vpop.f32.mrf.mxu1 }
 0x3b0   :  { %v2405_v32 = vadd.f32 %v3453_v46, %v4084_v37  ;;  %3163 = vmatpush3.bf16.xpose.msra.mxu0 %v2640_v20  ;;  %v2532_v39 = vmul.f32 0.01, %v2394_v35  ;;  %vm2468_vm2 = vcmp.gt.f32.partialorder %v2394_v35, 0.0  ;;  %v2598_v45 = vsel %vm2470_vm0, %v2402_v18, %v2534_v22 }
 0x3b1   :  { %v2396_v56 = vpop.f32.mrf.mxu1  ;;  %v2530_v18 = vmul.f32 0.01, %v2386_v34  ;;  %v2381_v46 = vadd.f32 %v4084_v37, %v2380_v61  ;;  %v2514_v20 = vmul.f32 0.01, %v2322_v43  ;;  %v2706_v22 = vsel %vm760_vm6, %v2624_v1, 0 }
 0x3b2   :  { %vm2471_vm1 = vcmp.gt.f32.partialorder %v2405_v32, 0.0  ;;  %v2535_v49 = vmul.f32 0.01, %v2405_v32  ;;  %v2397_v8 = vadd.f32 %v4084_v37, %v2396_v56  ;;  %v2596_v54 = vsel %vm2468_vm2, %v2394_v35, %v2532_v39 }
 0x3b3   :  { %v2595_v35 = vsel %vm2467_vm7, %v2389_v41, %v2531_v15  ;;  %v2594_v9 = vsel %vm2466_vm8, %v2386_v34, %v2530_v18  ;;  %v2529_v19 = vmul.f32 0.01, %v2381_v46  ;;  %vm2465_vm11 = vcmp.gt.f32.partialorder %v2381_v46, 0.0 }
 0x3b4   :  { %v2599_v29 = vsel %vm2471_vm1, %v2405_v32, %v2535_v49  ;;  %vm2469_vm3 = vcmp.gt.f32.partialorder %v2397_v8, 0.0  ;;  %v2533_v55 = vmul.f32 0.01, %v2397_v8  ;;  %v2631_v21 = vpack.c.bf16 %v2595_v35, %v2594_v9 }
 0x3b5   :  { %v2633_v30 = vpack.c.bf16 %v2599_v29, %v2598_v45  ;;  %v2579_v32 = vsel %vm2451_vm9, %v2325_v31, %v2515_v33  ;;  %v2578_v61 = vsel %vm2450_vm10, %v2322_v43, %v2514_v20  ;;  %v2528_v56 = vmul.f32 0.01, %v2378_v40 }
 0x3b6   :  { %v2597_v51 = vsel %vm2469_vm3, %v2397_v8, %v2533_v55  ;;  %v2623_v24 = vpack.c.bf16 %v2579_v32, %v2578_v61  ;;  %v2513_v39 = vmul.f32 0.01, %v2317_v47  ;;  %v2373_v49 = vadd.f32 %v4285_v50, %v4084_v37 }
 0x3b7   :  { %v2632_v48 = vpack.c.bf16 %v2597_v51, %v2596_v54  ;;  %3463 = vmatprep.subr.msk.bf16.mxu1 %vm760_vm6, %v2633_v30  ;;  %3165 = vmatmul.mubr.msk.bf16.vlgmr.msra.gmra.mxu0 %vm760_vm6, %v4166_v52  ;;  %v2593_v8 = vsel %vm2465_vm11, %v2381_v46, %v2529_v19  ;;  %v2592_v41 = vsel %vm2464_vm12, %v2378_v40, %v2528_v56  ;;  %v2526_v30 = vmul.f32 0.01, %v2370_v14 }
 0x3b8   :  { %3167 = vmatpush3.bf16.xpose.msra.mxu1 %v2709_v58  ;;  %v2630_v42 = vpack.c.bf16 %v2593_v8, %v2592_v41  ;;  %v2703_v45 = vsel %vm760_vm6, %v2623_v24, 0  ;;  %v2577_v29 = vsel %vm2449_vm13, %v2317_v47, %v2513_v39  ;;  %v2527_v4 = vmul.f32 0.01, %v2373_v49 }
 0x3b9   :  { %3464 = vmatprep.subr.msk.bf16.mxu1 %vm760_vm6, %v2632_v48  ;;  %vm2463_vm15 = vcmp.gt.f32.partialorder %v2373_v49, 0.0  ;;  %v2576_v55 = vsel %vm2448_vm14, %v2314_v3, %v2512_v10  ;;  %vm2462_vm0 = vcmp.gt.f32.partialorder %v2370_v14, 0.0  ;;  %v2365_v34 = vadd.f32 %v4084_v37, %v4291_v25 }
 0x3ba   :  { %v2622_v50 = vpack.c.bf16 %v2577_v29, %v2576_v55  ;;  %v2591_v27 = vsel %vm2463_vm15, %v2373_v49, %v2527_v4  ;;  %v2590_v62 = vsel %vm2462_vm0, %v2370_v14, %v2526_v30  ;;  %v2362_v54 = vadd.f32 %v4084_v37, %v4277_v13 }
 0x3bb   :  { %v2629_v51 = vpack.c.bf16 %v2591_v27, %v2590_v62  ;;  %v2525_v58 = vmul.f32 0.01, %v2365_v34  ;;  %vm2461_vm1 = vcmp.gt.f32.partialorder %v2365_v34, 0.0  ;;  %v2697_v25 = vsel %vm760_vm6, %v2621_v23, 0 }
 0x3bc   :  { %v2700_v48 = vsel %vm760_vm6, %v2622_v50, 0  ;;  %v2524_v31 = vmul.f32 0.01, %v2362_v54  ;;  %vm2460_vm2 = vcmp.gt.f32.partialorder %v2362_v54, 0.0  ;;  %v2694_v37 = vsel %vm760_vm6, %v2620_v12, 0 }
 0x3bd   :  { %v2589_v59 = vsel %vm2461_vm1, %v2365_v34, %v2525_v58 }
 0x3be   :  { %v2588_v15 = vsel %vm2460_vm2, %v2362_v54, %v2524_v31 }
 0x3bf   :  { %v2628_v43 = vpack.c.bf16 %v2589_v59, %v2588_v15 }
 0x3c0   :  { %3169 = vmatpush3.bf16.xpose.msra.mxu1 %v2706_v22 }
 0x3c1   :  { %3465 = vmatprep.subr.msk.bf16.mxu1 %vm760_vm6, %v2631_v21 }
 0x3c8   :  { %3171 = vmatpush3.bf16.xpose.msra.mxu1 %v2703_v45 }
 0x3c9   :  { %3466 = vmatprep.subr.msk.bf16.mxu1 %vm760_vm6, %v2630_v42 }
 0x3d0   :  { %3173 = vmatpush3.bf16.xpose.msra.mxu1 %v2700_v48 }
 0x3d1   :  { %3467 = vmatprep.subr.msk.bf16.mxu1 %vm760_vm6, %v2629_v51 }
 0x3d8   :  { %3175 = vmatpush3.bf16.xpose.msra.mxu1 %v2697_v25 }
 0x3d9   :  { %3468 = vmatprep.subr.msk.bf16.mxu1 %vm760_vm6, %v2628_v43 }
 0x3e0   :  { %3177 = vmatpush3.bf16.xpose.msra.mxu1 %v2694_v37 }
 0x3e1   :  { %3469 = vmatprep.subr.msk.bf16.mxu1 %vm760_vm6, %v2627_v57  ;;  %v2824_v57 = vunpack.c.l.s4 %v3501_v53 }
 0x3e3   :  { %v2825_v28 = vunpack.c.0.s8 %v2824_v57 }
 0x3e8   :  { %3179 = vmatpush3.bf16.xpose.msra.mxu1 %v2691_v63 }
 0x3e9   :  { %3470 = vmatprep.subr.msk.bf16.mxu1 %vm760_vm6, %v2626_v44 }
 0x3f0   :  { %3181 = vmatpush3.bf16.xpose.msra.mxu1 %v2688_v0 }
 0x3f7   :  { %3183 = vmatmul.mubr.msk.bf16.vlgmr.msra.gmra.mxu1 %vm760_vm6, %v4166_v52  ;;  %v2828_v52 = vsub.s32 %v2825_v28, %v2827_v26  ;;  %vm2848_vm6 = vcmp.lt.s32.totalorder %v2826_v17, 512 }
 0x477   :  { %v2769_v60 = vpop.f32.mrf.mxu0 }
 0x478   :  { %v2770_v11 = vadd.f32 %v2769_v60, %v2635_v2 }
 0x479   :  { %v2771_v23 = vpop.f32.mrf.mxu0 }
 0x47a   :  { %v2772_v5 = vadd.f32 %v2771_v23, %v2635_v2 }
 0x47b   :  { %v2773_v7 = vpop.f32.mrf.mxu0 }
 0x47c   :  { %v2821_v12 = vcombine.low %v2770_v11, %v2772_v5 }
 0x47d   :  { %v2774_v36 = vpop.f32.mrf.mxu0 }
 0x47e   :  { %v2829_v33 = vrot.slane %v2821_v12, %v2828_v52 }
 0x4b7   :  { %v2810_v13 = vpop.f32.mrf.mxu1 }
 0x4b8   :  { %v2811_v38 = vadd.f32 %v2810_v13, %v2635_v2 }
 0x4b9   :  { %v2812_v6 = vpop.f32.mrf.mxu1 }
 0x4ba   :  { %v2813_v44 = vadd.f32 %v2812_v6, %v2635_v2 }
 0x4bb   :  { %v2814_v16 = vpop.f32.mrf.mxu1 }
 0x4bc   :  { %v2822_v18 = vcombine.low %v2811_v38, %v2813_v44 }
 0x4bd   :  { %v2815_v1 = vpop.f32.mrf.mxu1 }
 0x4be   :  { %v2836_v35 = vrot.slane %v2822_v18, %v2828_v52 }
 0x4c0   :  { %v2837_v46 = vcombine.low %v2829_v33, %v2836_v35 }
 0x4c2   :  { %v2844_v20 = vrot.slane %v2837_v46, %v2828_v52 }
 0x4c4   :  { %2850 = vst.msk [vmem:[#allocation3] sm:$0xf] %vm2848_vm6, %v2844_v20 }
 0x4c5   :  { %3490 = shalt.err (!%p3487_p4)
}
 0x4c6   :  { %2860 = dma.vmem_to_hbm [thread:$0]  %s2858_s13, 64, %s4390_s5, [#allocation4]  }
 0x4c7   :  { %3499 = dma.done.wait [#allocation4], 64  }
 0x4c8   :  { %3500 = vsyncadd [#allocation4], 4294967232 }
 0x4c9   :  { %2864 = vsyncpa [#allocation4], 1 }

</bundles_post_ra>
